<compile_context>
chip_gen: v7x
topology: tpu7x:2x2x1
jax: 0.10.0
libtpu: 0.0.40
codegen_flags: <defaults>
</compile_context>

<pallas_src>
import functools

import jax
import jax.numpy as jnp
import numpy as np
from jax import lax
from jax.experimental import pallas as pl
from jax.experimental.pallas import tpu as pltpu


def _round_up(x, m):
    return (x + m - 1) // m * m


# ---------------------------------------------------------------------------
# Kernel 1: tiled conv-as-matmul (bf16 x bf16 -> f32) with fused per-channel
# BN statistics (sum, sum-of-squares) accumulated in the epilogue.
# Grid = (OC tiles, M tiles, K tiles): K innermost; the f32 output block is
# the accumulator (resident across K), OC outermost so the [1, tn] stats
# blocks stay resident across all M/K steps.
# ---------------------------------------------------------------------------
def _matmul_stats_kernel(p_ref, w_ref, y_ref, sum_ref, sq_ref):
    mi = pl.program_id(1)
    ki = pl.program_id(2)
    nk = pl.num_programs(2)

    @pl.when(ki == 0)
    def _init_acc():
        y_ref[...] = jnp.zeros_like(y_ref)

    y_ref[...] += jnp.dot(p_ref[...], w_ref[...],
                          preferred_element_type=jnp.float32)

    @pl.when(jnp.logical_and(ki == nk - 1, mi == 0))
    def _init_stats():
        sum_ref[...] = jnp.zeros_like(sum_ref)
        sq_ref[...] = jnp.zeros_like(sq_ref)

    @pl.when(ki == nk - 1)
    def _finalize():
        y = y_ref[...]
        sum_ref[...] += jnp.sum(y, axis=0, keepdims=True)
        sq_ref[...] += jnp.sum(y * y, axis=0, keepdims=True)


def conv_matmul_stats(patches, weight_mat, *, tm, tk, tn):
    """patches [M, K] @ weight_mat [K, OC] -> (y [Mp, OCp] f32, sum, sumsq [1, OCp])."""
    M, K = patches.shape
    _, OC = weight_mat.shape
    Mp, Kp, OCp = _round_up(M, tm), _round_up(K, tk), _round_up(OC, tn)

    # bf16 operands for the MXU; zero padding keeps the statistics exact.
    p = jnp.pad(patches.astype(jnp.bfloat16), ((0, Mp - M), (0, Kp - K)))
    w = jnp.pad(weight_mat.astype(jnp.bfloat16), ((0, Kp - K), (0, OCp - OC)))

    grid = (OCp // tn, Mp // tm, Kp // tk)
    cost = pl.CostEstimate(
        flops=2 * Mp * Kp * OCp,
        transcendentals=0,
        bytes_accessed=Mp * Kp * 2 + Kp * OCp * 2 + Mp * OCp * 4 + 2 * OCp * 4)

    y, csum, csq = pl.pallas_call(
        _matmul_stats_kernel,
        out_shape=(jax.ShapeDtypeStruct((Mp, OCp), jnp.float32),
                   jax.ShapeDtypeStruct((1, OCp), jnp.float32),
                   jax.ShapeDtypeStruct((1, OCp), jnp.float32)),
        grid_spec=pltpu.PrefetchScalarGridSpec(
            num_scalar_prefetch=0,
            grid=grid,
            in_specs=[
                pl.BlockSpec((tm, tk), lambda ni, mi, ki: (mi, ki)),
                pl.BlockSpec((tk, tn), lambda ni, mi, ki: (ki, ni)),
            ],
            out_specs=[
                pl.BlockSpec((tm, tn), lambda ni, mi, ki: (mi, ni)),
                pl.BlockSpec((1, tn), lambda ni, mi, ki: (0, ni)),
                pl.BlockSpec((1, tn), lambda ni, mi, ki: (0, ni)),
            ]),
        compiler_params=pltpu.CompilerParams(
            # OC tiles are independent -> "parallel" (megacore sharding).
            # M must stay "arbitrary": per-channel stats accumulate across it.
            dimension_semantics=("parallel", "arbitrary", "arbitrary")),
        cost_estimate=cost,
    )(p, w)
    return y, csum, csq


# ---------------------------------------------------------------------------
# Elementwise tiles: reuse the matmul M tile (it divides Mp exactly) and go
# full-OCp wide when that keeps a single operand tile <= ~2 MiB, so stores are
# as lane-dense as possible.
# ---------------------------------------------------------------------------
def _ew_tiles(Mp, OCp, tm_mm, tn_mm, *, budget_bytes=2 << 20):
    tn = OCp if OCp * tm_mm * 4 <= budget_bytes else tn_mm
    return tm_mm, tn


# ---------------------------------------------------------------------------
# Kernel 2: tiled elementwise BN-affine (+ optional ReLU):  y*scale + shift
# (scale/shift are per-channel, precomputed once outside the kernel)
# ---------------------------------------------------------------------------
def _affine_act_kernel(y_ref, s_ref, b_ref, o_ref, *, relu):
    out = y_ref[...] * s_ref[...] + b_ref[...]
    if relu:
        out = jnp.maximum(out, 0.0)
    o_ref[...] = out.astype(o_ref.dtype)


def affine_act(y, scale, shift, *, tm_hint, tn_hint, relu, out_dtype):
    Mp, OCp = y.shape
    tm, tn = _ew_tiles(Mp, OCp, tm_hint, tn_hint)
    return pl.pallas_call(
        functools.partial(_affine_act_kernel, relu=relu),
        out_shape=jax.ShapeDtypeStruct((Mp, OCp), out_dtype),
        grid_spec=pltpu.PrefetchScalarGridSpec(
            num_scalar_prefetch=0,
            grid=(Mp // tm, OCp // tn),
            in_specs=[
                pl.BlockSpec((tm, tn), lambda mi, ni: (mi, ni)),
                pl.BlockSpec((1, tn), lambda mi, ni: (0, ni)),
                pl.BlockSpec((1, tn), lambda mi, ni: (0, ni)),
            ],
            out_specs=pl.BlockSpec((tm, tn), lambda mi, ni: (mi, ni))),
        compiler_params=pltpu.CompilerParams(
            dimension_semantics=("parallel", "parallel")),
    )(y, scale, shift)


# ---------------------------------------------------------------------------
# Kernel 3: fused residual tail:  relu(a*sa + ba  +  b*sb + bb)
# (conv3 BN-affine + shortcut BN-affine + add + ReLU in one pass)
# ---------------------------------------------------------------------------
def _residual_affine_relu_kernel(a_ref, sa_ref, ba_ref, b_ref, sb_ref, bb_ref,
                                 o_ref):
    out = (a_ref[...] * sa_ref[...] + ba_ref[...]
           + b_ref[...] * sb_ref[...] + bb_ref[...])
    o_ref[...] = jnp.maximum(out, 0.0).astype(o_ref.dtype)


def residual_affine_relu(a, sa, ba, b, sb, bb, *, tm_hint, tn_hint,
                         out_dtype=jnp.float32):
    Mp, OCp = a.shape
    tm, tn = _ew_tiles(Mp, OCp, tm_hint, tn_hint)
    return pl.pallas_call(
        _residual_affine_relu_kernel,
        out_shape=jax.ShapeDtypeStruct((Mp, OCp), out_dtype),
        grid_spec=pltpu.PrefetchScalarGridSpec(
            num_scalar_prefetch=0,
            grid=(Mp // tm, OCp // tn),
            in_specs=[
                pl.BlockSpec((tm, tn), lambda mi, ni: (mi, ni)),
                pl.BlockSpec((1, tn), lambda mi, ni: (0, ni)),
                pl.BlockSpec((1, tn), lambda mi, ni: (0, ni)),
                pl.BlockSpec((tm, tn), lambda mi, ni: (mi, ni)),
                pl.BlockSpec((1, tn), lambda mi, ni: (0, ni)),
                pl.BlockSpec((1, tn), lambda mi, ni: (0, ni)),
            ],
            out_specs=pl.BlockSpec((tm, tn), lambda mi, ni: (mi, ni))),
        compiler_params=pltpu.CompilerParams(
            dimension_semantics=("parallel", "parallel")),
    )(a, sa, ba, b, sb, bb)


# ---------------------------------------------------------------------------
# Plain-JAX glue: NHWC im2col (no transposes), BN scale/shift, staging.
# ---------------------------------------------------------------------------
def _im2col_nhwc(x_nhwc, KH, KW, stride, padding, dilation=1):
    """Returns patches [N*OH*OW, KH*KW*C] with rows in (n, oh, ow) order and
    K in (kh, kw, c) order, plus (OH, OW)."""
    N, H, W, C = x_nhwc.shape
    s, p, d = stride, padding, dilation
    OH = (H + 2 * p - d * (KH - 1) - 1) // s + 1
    OW = (W + 2 * p - d * (KW - 1) - 1) // s + 1
    if KH == 1 and KW == 1 and p == 0:
        patches = x_nhwc[:, ::s, ::s, :]
    else:
        xp = jnp.pad(x_nhwc, ((0, 0), (p, p), (p, p), (0, 0)))
        cols = []
        for kh in range(KH):
            for kw in range(KW):
                cols.append(xp[:, kh * d: kh * d + (OH - 1) * s + 1: s,
                                  kw * d: kw * d + (OW - 1) * s + 1: s, :])
        patches = jnp.concatenate(cols, axis=-1)      # NHWC, K = (kh, kw, c)
    return patches.reshape(N * OH * OW, KH * KW * C), OH, OW


def _pick_tiles(M, K, OC):
    # Largest tiles that keep total double-buffered VMEM use at a few MB
    # (safe on v7x's 64 MiB); M tile rounded to 16 for bf16 sublane packing,
    # K/OC tiles to lane multiples of 128 (lane-dense stores).
    tm = min(512, _round_up(M, 16))
    tk = min(512, _round_up(K, 128))
    tn = min(256, _round_up(OC, 128))
    return tm, tk, tn


def _bn_scale_shift(csum, csq, gamma, beta, count, eps):
    """Per-channel scale/shift so that BN(y) = y*scale + shift (tiny, plain JAX)."""
    OCp = csum.shape[1]
    OC = gamma.shape[0]
    mean = csum / count
    var = jnp.maximum(csq / count - mean * mean, 0.0)   # biased var (training BN)
    g = jnp.pad(gamma.astype(jnp.float32), (0, OCp - OC)).reshape(1, OCp)
    b = jnp.pad(beta.astype(jnp.float32), (0, OCp - OC)).reshape(1, OCp)
    scale = g * lax.rsqrt(var + eps)
    shift = b - mean * scale
    return scale, shift


def conv_bn_prepare(x_nhwc, weight, gamma, beta, *, stride, padding,
                    dilation=1, eps=1e-5):
    """Conv (im2col matmul with fused batch-stats) + BN scale/shift.
    Returns (padded un-normalized conv output [Mp, OCp] f32, scale, shift, meta)."""
    N, H, W, C = x_nhwc.shape
    OC, _, KH, KW = weight.shape
    patches, OH, OW = _im2col_nhwc(x_nhwc, KH, KW, stride, padding, dilation)
    wmat = weight.transpose(2, 3, 1, 0).reshape(KH * KW * C, OC)  # (kh,kw,c) x OC
    M, K = patches.shape
    tm, tk, tn = _pick_tiles(M, K, OC)
    y, csum, csq = conv_matmul_stats(patches, wmat, tm=tm, tk=tk, tn=tn)
    scale, shift = _bn_scale_shift(csum, csq, gamma, beta, float(M), eps)
    meta = dict(N=N, OH=OH, OW=OW, M=M, OC=OC, tm=tm, tn=tn)
    return y, scale, shift, meta


def bn_conv2d(x_nhwc, weight, gamma, beta, *, stride, padding, dilation=1,
              activation=True, eps=1e-5, out_dtype=jnp.bfloat16):
    """BN_Conv2d: Conv -> BatchNorm(batch stats) -> (ReLU).  NHWC in / NHWC out."""
    # TODO(synk): grouped convolution (groups > 1) not implemented (not used by BottleNeck).
    y, scale, shift, m = conv_bn_prepare(x_nhwc, weight, gamma, beta,
                                         stride=stride, padding=padding,
                                         dilation=dilation, eps=eps)
    out = affine_act(y, scale, shift, tm_hint=m["tm"], tn_hint=m["tn"],
                     relu=activation, out_dtype=out_dtype)
    return out[:m["M"], :m["OC"]].reshape(m["N"], m["OH"], m["OW"], m["OC"])


def bottleneck_forward(x, params, *, strides, eps=1e-5):
    """x: [N, C, H, W] (NCHW) f32.  Returns relu(conv3(conv2(conv1(x))) + shortcut(x))."""
    x_nhwc = jnp.transpose(x, (0, 2, 3, 1))

    a = bn_conv2d(x_nhwc, params["w1"], params["g1"], params["b1"],
                  stride=1, padding=0, activation=True, eps=eps)
    a = bn_conv2d(a, params["w2"], params["g2"], params["b2"],
                  stride=strides, padding=1, activation=True, eps=eps)

    # conv3 (no activation) and shortcut: defer the BN affine so the residual
    # add + final ReLU fuse into one elementwise pass over the big activations.
    y3, s3, t3, m3 = conv_bn_prepare(a, params["w3"], params["g3"], params["b3"],
                                     stride=1, padding=0, eps=eps)
    ys, ss, ts, ms = conv_bn_prepare(x_nhwc, params["ws"], params["gs"],
                                     params["bs"], stride=strides, padding=0,
                                     eps=eps)
    assert y3.shape == ys.shape and m3["tm"] == ms["tm"] and m3["tn"] == ms["tn"]

    out = residual_affine_relu(y3, s3, t3, ys, ss, ts,
                               tm_hint=m3["tm"], tn_hint=m3["tn"],
                               out_dtype=jnp.float32)
    out = out[:m3["M"], :m3["OC"]].reshape(m3["N"], m3["OH"], m3["OW"], m3["OC"])
    return jnp.transpose(out, (0, 3, 1, 2))            # back to NCHW


# ---------------------------------------------------------------------------
# Pure-JAX reference (mirrors the bf16 matmul operands / fp32 accumulation).
# ---------------------------------------------------------------------------
def reference_forward(x, params, *, strides, eps=1e-5):
    def conv(x, w, stride, padding):
        return lax.conv_general_dilated(
            x.astype(jnp.bfloat16), w.astype(jnp.bfloat16),
            window_strides=(stride, stride),
            padding=[(padding, padding), (padding, padding)],
            dimension_numbers=("NCHW", "OIHW", "NCHW"),
            preferred_element_type=jnp.float32)

    def bn(y, g, b):
        mean = jnp.mean(y, axis=(0, 2, 3), keepdims=True)
        var = jnp.mean((y - mean) ** 2, axis=(0, 2, 3), keepdims=True)
        return ((y - mean) * lax.rsqrt(var + eps) * g.reshape(1, -1, 1, 1)
                + b.reshape(1, -1, 1, 1))

    a = jnp.maximum(bn(conv(x, params["w1"], 1, 0), params["g1"], params["b1"]), 0.0)
    a = jnp.maximum(bn(conv(a, params["w2"], strides, 1), params["g2"], params["b2"]), 0.0)
    main = bn(conv(a, params["w3"], 1, 0), params["g3"], params["b3"])
    sc = bn(conv(x, params["ws"], strides, 0), params["gs"], params["bs"])
    return jnp.maximum(main + sc, 0.0)


if __name__ == "__main__":
    # BottleNeck(in_channels=16, out_channels=8, strides=2) on a 2x16x14x14 input.
    N, Cin, H, W = 2, 16, 14, 14
    out_channels = 8
    strides = 2
    OC4 = out_channels * 4

    key = jax.random.PRNGKey(0)
    keys = jax.random.split(key, 10)

    def kaiming(k, shape):
        fan_in = shape[1] * shape[2] * shape[3]
        bound = 1.0 / np.sqrt(fan_in)
        return jax.random.uniform(k, shape, jnp.float32, -bound, bound)

    x = jax.random.normal(keys[0], (N, Cin, H, W), dtype=jnp.float32)
    params = {
        "w1": kaiming(keys[1], (out_channels, Cin, 1, 1)),
        "g1": 1.0 + 0.1 * jax.random.normal(keys[2], (out_channels,)),
        "b1": 0.1 * jax.random.normal(keys[3], (out_channels,)),
        "w2": kaiming(keys[4], (out_channels, out_channels, 3, 3)),
        "g2": 1.0 + 0.1 * jax.random.normal(keys[5], (out_channels,)),
        "b2": 0.1 * jax.random.normal(keys[6], (out_channels,)),
        "w3": kaiming(keys[7], (OC4, out_channels, 1, 1)),
        "g3": jnp.ones((OC4,), jnp.float32),
        "b3": jnp.zeros((OC4,), jnp.float32),
        "ws": kaiming(keys[8], (OC4, Cin, 1, 1)),
        "gs": 1.0 + 0.1 * jax.random.normal(keys[9], (OC4,)),
        "bs": jnp.zeros((OC4,), jnp.float32),
    }

    fwd = jax.jit(functools.partial(bottleneck_forward, strides=strides))
    out = jax.block_until_ready(fwd(x, params))

    ref = reference_forward(x, params, strides=strides)
    # Tolerance covers bf16 rounding of the MXU operands / intermediate
    # activations (mirrored in the reference up to accumulation order).
    np.testing.assert_allclose(np.asarray(out), np.asarray(ref),
                               rtol=2e-2, atol=2e-2)
    print("KERNEL_OK")
</pallas_src>

<mosaic_0001>
module attributes {stable_mosaic.version = 11 : i64} {
  func.func @_matmul_stats_kernel(%arg0: i32, %arg1: i32, %arg2: i32, %arg3: memref<400x128xbf16, #tpu.memory_space<vmem>>, %arg4: memref<128x128xbf16, #tpu.memory_space<vmem>>, %arg5: memref<400x128xf32, #tpu.memory_space<vmem>>, %arg6: memref<1x128xf32, #tpu.memory_space<vmem>>, %arg7: memref<1x128xf32, #tpu.memory_space<vmem>>) attributes {dimension_semantics = [#tpu.dimension_semantics<parallel>, #tpu.dimension_semantics<arbitrary>, #tpu.dimension_semantics<arbitrary>], iteration_bounds = array<i64: 1, 1, 1>, scalar_prefetch = 0 : i64, scratch_operands = 0 : i64, tpu.core_type = #tpu.core_type<tc>, window_params = [{transform_indices = @transform_0, window_bounds = array<i64: 400, 128>}, {transform_indices = @transform_1, window_bounds = array<i64: 128, 128>}, {transform_indices = @transform_2, window_bounds = array<i64: 400, 128>}, {transform_indices = @transform_3, window_bounds = array<i64: 1, 128>}, {transform_indices = @transform_4, window_bounds = array<i64: 1, 128>}]} {
    %c0_i32 = arith.constant 0 : i32
    %0 = arith.cmpi eq, %arg2, %c0_i32 : i32
    %1 = arith.extui %0 : i1 to i32
    %c0_i32_0 = arith.constant 0 : i32
    %2 = arith.cmpi ne, %1, %c0_i32_0 : i32
    scf.if %2 {
      %cst_13 = arith.constant 0.000000e+00 : f32
      %17 = vector.broadcast %cst_13 : f32 to vector<400x128xf32>
      %c0_14 = arith.constant 0 : index
      %c0_15 = arith.constant 0 : index
      %18 = vector.load %arg5[%c0_14, %c0_15] : memref<400x128xf32, #tpu.memory_space<vmem>>, vector<400x128xf32>
      tpu.vector_store %arg5[%c0_14, %c0_15], %17 {strides = array<i32>} : memref<400x128xf32, #tpu.memory_space<vmem>>, vector<400x128xf32>,
    } else {
    }
    %c0 = arith.constant 0 : index
    %c0_1 = arith.constant 0 : index
    %3 = vector.load %arg5[%c0, %c0_1] : memref<400x128xf32, #tpu.memory_space<vmem>>, vector<400x128xf32>
    %c0_2 = arith.constant 0 : index
    %c0_3 = arith.constant 0 : index
    %4 = vector.load %arg3[%c0_2, %c0_3] : memref<400x128xbf16, #tpu.memory_space<vmem>>, vector<400x128xbf16>
    %c0_4 = arith.constant 0 : index
    %c0_5 = arith.constant 0 : index
    %5 = vector.load %arg4[%c0_4, %c0_5] : memref<128x128xbf16, #tpu.memory_space<vmem>>, vector<128x128xbf16>
    %cst = arith.constant dense<0.000000e+00> : vector<400x128xf32>
    %6 = tpu.matmul %4, %5, %cst {dimension_numbers = #tpu.dot_dimension_numbers<[1], [0], [0], [1], [0, 0, 1, 1], [], []>} : vector<400x128xbf16>, vector<128x128xbf16>, vector<400x128xf32> -> vector<400x128xf32>
    %7 = arith.addf %3, %6 : vector<400x128xf32>
    %c0_6 = arith.constant 0 : index
    %c0_7 = arith.constant 0 : index
    %8 = vector.load %arg5[%c0_6, %c0_7] : memref<400x128xf32, #tpu.memory_space<vmem>>, vector<400x128xf32>
    tpu.vector_store %arg5[%c0_6, %c0_7], %7 {strides = array<i32>} : memref<400x128xf32, #tpu.memory_space<vmem>>, vector<400x128xf32>,
    %c0_i32_8 = arith.constant 0 : i32
    %9 = arith.cmpi eq, %arg2, %c0_i32_8 : i32
    %c0_i32_9 = arith.constant 0 : i32
    %10 = arith.cmpi eq, %arg1, %c0_i32_9 : i32
    %11 = arith.andi %9, %10 : i1
    %12 = arith.extui %11 : i1 to i32
    %c0_i32_10 = arith.constant 0 : i32
    %13 = arith.cmpi ne, %12, %c0_i32_10 : i32
    scf.if %13 {
      %cst_13 = arith.constant 0.000000e+00 : f32
      %17 = vector.broadcast %cst_13 : f32 to vector<1x128xf32>
      %c0_14 = arith.constant 0 : index
      %c0_15 = arith.constant 0 : index
      %18 = vector.load %arg6[%c0_14, %c0_15] : memref<1x128xf32, #tpu.memory_space<vmem>>, vector<1x128xf32>
      tpu.vector_store %arg6[%c0_14, %c0_15], %17 {strides = array<i32>} : memref<1x128xf32, #tpu.memory_space<vmem>>, vector<1x128xf32>,
      %cst_16 = arith.constant 0.000000e+00 : f32
      %19 = vector.broadcast %cst_16 : f32 to vector<1x128xf32>
      %c0_17 = arith.constant 0 : index
      %c0_18 = arith.constant 0 : index
      %20 = vector.load %arg7[%c0_17, %c0_18] : memref<1x128xf32, #tpu.memory_space<vmem>>, vector<1x128xf32>
      tpu.vector_store %arg7[%c0_17, %c0_18], %19 {strides = array<i32>} : memref<1x128xf32, #tpu.memory_space<vmem>>, vector<1x128xf32>,
    } else {
    }
    %c0_i32_11 = arith.constant 0 : i32
    %14 = arith.cmpi eq, %arg2, %c0_i32_11 : i32
    %15 = arith.extui %14 : i1 to i32
    %c0_i32_12 = arith.constant 0 : i32
    %16 = arith.cmpi ne, %15, %c0_i32_12 : i32
    scf.if %16 {
      %c0_13 = arith.constant 0 : index
      %c0_14 = arith.constant 0 : index
      %17 = vector.load %arg5[%c0_13, %c0_14] : memref<400x128xf32, #tpu.memory_space<vmem>>, vector<400x128xf32>
      %c0_15 = arith.constant 0 : index
      %c0_16 = arith.constant 0 : index
      %18 = vector.load %arg6[%c0_15, %c0_16] : memref<1x128xf32, #tpu.memory_space<vmem>>, vector<1x128xf32>
      %cst_17 = arith.constant dense<0.000000e+00> : vector<128xf32>
      %19 = vector.multi_reduction <add>, %17, %cst_17 [0] : vector<400x128xf32> to vector<128xf32>
      %20 = vector.shape_cast %19 : vector<128xf32> to vector<1x128xf32>
      %21 = arith.addf %18, %20 : vector<1x128xf32>
      %c0_18 = arith.constant 0 : index
      %c0_19 = arith.constant 0 : index
      %22 = vector.load %arg6[%c0_18, %c0_19] : memref<1x128xf32, #tpu.memory_space<vmem>>, vector<1x128xf32>
      tpu.vector_store %arg6[%c0_18, %c0_19], %21 {strides = array<i32>} : memref<1x128xf32, #tpu.memory_space<vmem>>, vector<1x128xf32>,
      %c0_20 = arith.constant 0 : index
      %c0_21 = arith.constant 0 : index
      %23 = vector.load %arg7[%c0_20, %c0_21] : memref<1x128xf32, #tpu.memory_space<vmem>>, vector<1x128xf32>
      %24 = arith.mulf %17, %17 : vector<400x128xf32>
      %cst_22 = arith.constant dense<0.000000e+00> : vector<128xf32>
      %25 = vector.multi_reduction <add>, %24, %cst_22 [0] : vector<400x128xf32> to vector<128xf32>
      %26 = vector.shape_cast %25 : vector<128xf32> to vector<1x128xf32>
      %27 = arith.addf %23, %26 : vector<1x128xf32>
      %c0_23 = arith.constant 0 : index
      %c0_24 = arith.constant 0 : index
      %28 = vector.load %arg7[%c0_23, %c0_24] : memref<1x128xf32, #tpu.memory_space<vmem>>, vector<1x128xf32>
      tpu.vector_store %arg7[%c0_23, %c0_24], %27 {strides = array<i32>} : memref<1x128xf32, #tpu.memory_space<vmem>>, vector<1x128xf32>,
    } else {
    }
    return
  }
  func.func @transform_0(%arg0: i32, %arg1: i32, %arg2: i32) -> (i32, i32) {
    %c0_i32 = arith.constant 0 : i32
    return %arg1, %arg2 : i32, i32
  }
  func.func @transform_1(%arg0: i32, %arg1: i32, %arg2: i32) -> (i32, i32) {
    %c0_i32 = arith.constant 0 : i32
    return %arg2, %arg0 : i32, i32
  }
  func.func @transform_2(%arg0: i32, %arg1: i32, %arg2: i32) -> (i32, i32) {
    %c0_i32 = arith.constant 0 : i32
    return %arg1, %arg0 : i32, i32
  }
  func.func @transform_3(%arg0: i32, %arg1: i32, %arg2: i32) -> (i32, i32) {
    %c0_i32 = arith.constant 0 : i32
    %c0_i32_0 = arith.constant 0 : i32
    return %c0_i32, %arg0 : i32, i32
  }
  func.func @transform_4(%arg0: i32, %arg1: i32, %arg2: i32) -> (i32, i32) {
    %c0_i32 = arith.constant 0 : i32
    %c0_i32_0 = arith.constant 0 : i32
    return %c0_i32, %arg0 : i32, i32
  }
}

module attributes {stable_mosaic.version = 11 : i64} {
  func.func @_affine_act_kernel(%arg0: i32, %arg1: i32, %arg2: memref<400x128xf32, #tpu.memory_space<vmem>>, %arg3: memref<1x128xf32, #tpu.memory_space<vmem>>, %arg4: memref<1x128xf32, #tpu.memory_space<vmem>>, %arg5: memref<400x128xbf16, #tpu.memory_space<vmem>>) attributes {dimension_semantics = [#tpu.dimension_semantics<parallel>, #tpu.dimension_semantics<parallel>], iteration_bounds = array<i64: 1, 1>, scalar_prefetch = 0 : i64, scratch_operands = 0 : i64, tpu.core_type = #tpu.core_type<tc>, window_params = [{transform_indices = @transform_0, window_bounds = array<i64: 400, 128>}, {transform_indices = @transform_1, window_bounds = array<i64: 1, 128>}, {transform_indices = @transform_2, window_bounds = array<i64: 1, 128>}, {transform_indices = @transform_3, window_bounds = array<i64: 400, 128>}]} {
    %c0 = arith.constant 0 : index
    %c0_0 = arith.constant 0 : index
    %0 = vector.load %arg2[%c0, %c0_0] : memref<400x128xf32, #tpu.memory_space<vmem>>, vector<400x128xf32>
    %c0_1 = arith.constant 0 : index
    %c0_2 = arith.constant 0 : index
    %1 = vector.load %arg3[%c0_1, %c0_2] : memref<1x128xf32, #tpu.memory_space<vmem>>, vector<1x128xf32>
    %2 = vector.broadcast %1 : vector<1x128xf32> to vector<400x128xf32>
    %3 = arith.mulf %0, %2 : vector<400x128xf32>
    %c0_3 = arith.constant 0 : index
    %c0_4 = arith.constant 0 : index
    %4 = vector.load %arg4[%c0_3, %c0_4] : memref<1x128xf32, #tpu.memory_space<vmem>>, vector<1x128xf32>
    %5 = vector.broadcast %4 : vector<1x128xf32> to vector<400x128xf32>
    %6 = arith.addf %3, %5 : vector<400x128xf32>
    %cst = arith.constant 0.000000e+00 : f32
    %7 = vector.broadcast %cst : f32 to vector<400x128xf32>
    %8 = arith.maximumf %6, %7 : vector<400x128xf32>
    %9 = arith.truncf %8 : vector<400x128xf32> to vector<400x128xbf16>
    %c0_5 = arith.constant 0 : index
    %c0_6 = arith.constant 0 : index
    %10 = vector.load %arg5[%c0_5, %c0_6] : memref<400x128xbf16, #tpu.memory_space<vmem>>, vector<400x128xbf16>
    tpu.vector_store %arg5[%c0_5, %c0_6], %9 {strides = array<i32>} : memref<400x128xbf16, #tpu.memory_space<vmem>>, vector<400x128xbf16>,
    return
  }
  func.func @transform_0(%arg0: i32, %arg1: i32) -> (i32, i32) {
    %c0_i32 = arith.constant 0 : i32
    return %arg0, %arg1 : i32, i32
  }
  func.func @transform_1(%arg0: i32, %arg1: i32) -> (i32, i32) {
    %c0_i32 = arith.constant 0 : i32
    %c0_i32_0 = arith.constant 0 : i32
    return %c0_i32, %arg1 : i32, i32
  }
  func.func @transform_2(%arg0: i32, %arg1: i32) -> (i32, i32) {
    %c0_i32 = arith.constant 0 : i32
    %c0_i32_0 = arith.constant 0 : i32
    return %c0_i32, %arg1 : i32, i32
  }
  func.func @transform_3(%arg0: i32, %arg1: i32) -> (i32, i32) {
    %c0_i32 = arith.constant 0 : i32
    return %arg0, %arg1 : i32, i32
  }
}

module attributes {stable_mosaic.version = 11 : i64} {
  func.func @_affine_act_kernel(%arg0: i32, %arg1: i32, %arg2: memref<112x128xf32, #tpu.memory_space<vmem>>, %arg3: memref<1x128xf32, #tpu.memory_space<vmem>>, %arg4: memref<1x128xf32, #tpu.memory_space<vmem>>, %arg5: memref<112x128xbf16, #tpu.memory_space<vmem>>) attributes {dimension_semantics = [#tpu.dimension_semantics<parallel>, #tpu.dimension_semantics<parallel>], iteration_bounds = array<i64: 1, 1>, scalar_prefetch = 0 : i64, scratch_operands = 0 : i64, tpu.core_type = #tpu.core_type<tc>, window_params = [{transform_indices = @transform_0, window_bounds = array<i64: 112, 128>}, {transform_indices = @transform_1, window_bounds = array<i64: 1, 128>}, {transform_indices = @transform_2, window_bounds = array<i64: 1, 128>}, {transform_indices = @transform_3, window_bounds = array<i64: 112, 128>}]} {
    %c0 = arith.constant 0 : index
    %c0_0 = arith.constant 0 : index
    %0 = vector.load %arg2[%c0, %c0_0] : memref<112x128xf32, #tpu.memory_space<vmem>>, vector<112x128xf32>
    %c0_1 = arith.constant 0 : index
    %c0_2 = arith.constant 0 : index
    %1 = vector.load %arg3[%c0_1, %c0_2] : memref<1x128xf32, #tpu.memory_space<vmem>>, vector<1x128xf32>
    %2 = vector.broadcast %1 : vector<1x128xf32> to vector<112x128xf32>
    %3 = arith.mulf %0, %2 : vector<112x128xf32>
    %c0_3 = arith.constant 0 : index
    %c0_4 = arith.constant 0 : index
    %4 = vector.load %arg4[%c0_3, %c0_4] : memref<1x128xf32, #tpu.memory_space<vmem>>, vector<1x128xf32>
    %5 = vector.broadcast %4 : vector<1x128xf32> to vector<112x128xf32>
    %6 = arith.addf %3, %5 : vector<112x128xf32>
    %cst = arith.constant 0.000000e+00 : f32
    %7 = vector.broadcast %cst : f32 to vector<112x128xf32>
    %8 = arith.maximumf %6, %7 : vector<112x128xf32>
    %9 = arith.truncf %8 : vector<112x128xf32> to vector<112x128xbf16>
    %c0_5 = arith.constant 0 : index
    %c0_6 = arith.constant 0 : index
    %10 = vector.load %arg5[%c0_5, %c0_6] : memref<112x128xbf16, #tpu.memory_space<vmem>>, vector<112x128xbf16>
    tpu.vector_store %arg5[%c0_5, %c0_6], %9 {strides = array<i32>} : memref<112x128xbf16, #tpu.memory_space<vmem>>, vector<112x128xbf16>,
    return
  }
  func.func @transform_0(%arg0: i32, %arg1: i32) -> (i32, i32) {
    %c0_i32 = arith.constant 0 : i32
    return %arg0, %arg1 : i32, i32
  }
  func.func @transform_1(%arg0: i32, %arg1: i32) -> (i32, i32) {
    %c0_i32 = arith.constant 0 : i32
    %c0_i32_0 = arith.constant 0 : i32
    return %c0_i32, %arg1 : i32, i32
  }
  func.func @transform_2(%arg0: i32, %arg1: i32) -> (i32, i32) {
    %c0_i32 = arith.constant 0 : i32
    %c0_i32_0 = arith.constant 0 : i32
    return %c0_i32, %arg1 : i32, i32
  }
  func.func @transform_3(%arg0: i32, %arg1: i32) -> (i32, i32) {
    %c0_i32 = arith.constant 0 : i32
    return %arg0, %arg1 : i32, i32
  }
}

module attributes {stable_mosaic.version = 11 : i64} {
  func.func @_matmul_stats_kernel(%arg0: i32, %arg1: i32, %arg2: i32, %arg3: memref<112x128xbf16, #tpu.memory_space<vmem>>, %arg4: memref<128x128xbf16, #tpu.memory_space<vmem>>, %arg5: memref<112x128xf32, #tpu.memory_space<vmem>>, %arg6: memref<1x128xf32, #tpu.memory_space<vmem>>, %arg7: memref<1x128xf32, #tpu.memory_space<vmem>>) attributes {dimension_semantics = [#tpu.dimension_semantics<parallel>, #tpu.dimension_semantics<arbitrary>, #tpu.dimension_semantics<arbitrary>], iteration_bounds = array<i64: 1, 1, 1>, scalar_prefetch = 0 : i64, scratch_operands = 0 : i64, tpu.core_type = #tpu.core_type<tc>, window_params = [{transform_indices = @transform_0, window_bounds = array<i64: 112, 128>}, {transform_indices = @transform_1, window_bounds = array<i64: 128, 128>}, {transform_indices = @transform_2, window_bounds = array<i64: 112, 128>}, {transform_indices = @transform_3, window_bounds = array<i64: 1, 128>}, {transform_indices = @transform_4, window_bounds = array<i64: 1, 128>}]} {
    %c0_i32 = arith.constant 0 : i32
    %0 = arith.cmpi eq, %arg2, %c0_i32 : i32
    %1 = arith.extui %0 : i1 to i32
    %c0_i32_0 = arith.constant 0 : i32
    %2 = arith.cmpi ne, %1, %c0_i32_0 : i32
    scf.if %2 {
      %cst_13 = arith.constant 0.000000e+00 : f32
      %17 = vector.broadcast %cst_13 : f32 to vector<112x128xf32>
      %c0_14 = arith.constant 0 : index
      %c0_15 = arith.constant 0 : index
      %18 = vector.load %arg5[%c0_14, %c0_15] : memref<112x128xf32, #tpu.memory_space<vmem>>, vector<112x128xf32>
      tpu.vector_store %arg5[%c0_14, %c0_15], %17 {strides = array<i32>} : memref<112x128xf32, #tpu.memory_space<vmem>>, vector<112x128xf32>,
    } else {
    }
    %c0 = arith.constant 0 : index
    %c0_1 = arith.constant 0 : index
    %3 = vector.load %arg5[%c0, %c0_1] : memref<112x128xf32, #tpu.memory_space<vmem>>, vector<112x128xf32>
    %c0_2 = arith.constant 0 : index
    %c0_3 = arith.constant 0 : index
    %4 = vector.load %arg3[%c0_2, %c0_3] : memref<112x128xbf16, #tpu.memory_space<vmem>>, vector<112x128xbf16>
    %c0_4 = arith.constant 0 : index
    %c0_5 = arith.constant 0 : index
    %5 = vector.load %arg4[%c0_4, %c0_5] : memref<128x128xbf16, #tpu.memory_space<vmem>>, vector<128x128xbf16>
    %cst = arith.constant dense<0.000000e+00> : vector<112x128xf32>
    %6 = tpu.matmul %4, %5, %cst {dimension_numbers = #tpu.dot_dimension_numbers<[1], [0], [0], [1], [0, 0, 1, 1], [], []>} : vector<112x128xbf16>, vector<128x128xbf16>, vector<112x128xf32> -> vector<112x128xf32>
    %7 = arith.addf %3, %6 : vector<112x128xf32>
    %c0_6 = arith.constant 0 : index
    %c0_7 = arith.constant 0 : index
    %8 = vector.load %arg5[%c0_6, %c0_7] : memref<112x128xf32, #tpu.memory_space<vmem>>, vector<112x128xf32>
    tpu.vector_store %arg5[%c0_6, %c0_7], %7 {strides = array<i32>} : memref<112x128xf32, #tpu.memory_space<vmem>>, vector<112x128xf32>,
    %c0_i32_8 = arith.constant 0 : i32
    %9 = arith.cmpi eq, %arg2, %c0_i32_8 : i32
    %c0_i32_9 = arith.constant 0 : i32
    %10 = arith.cmpi eq, %arg1, %c0_i32_9 : i32
    %11 = arith.andi %9, %10 : i1
    %12 = arith.extui %11 : i1 to i32
    %c0_i32_10 = arith.constant 0 : i32
    %13 = arith.cmpi ne, %12, %c0_i32_10 : i32
    scf.if %13 {
      %cst_13 = arith.constant 0.000000e+00 : f32
      %17 = vector.broadcast %cst_13 : f32 to vector<1x128xf32>
      %c0_14 = arith.constant 0 : index
      %c0_15 = arith.constant 0 : index
      %18 = vector.load %arg6[%c0_14, %c0_15] : memref<1x128xf32, #tpu.memory_space<vmem>>, vector<1x128xf32>
      tpu.vector_store %arg6[%c0_14, %c0_15], %17 {strides = array<i32>} : memref<1x128xf32, #tpu.memory_space<vmem>>, vector<1x128xf32>,
      %cst_16 = arith.constant 0.000000e+00 : f32
      %19 = vector.broadcast %cst_16 : f32 to vector<1x128xf32>
      %c0_17 = arith.constant 0 : index
      %c0_18 = arith.constant 0 : index
      %20 = vector.load %arg7[%c0_17, %c0_18] : memref<1x128xf32, #tpu.memory_space<vmem>>, vector<1x128xf32>
      tpu.vector_store %arg7[%c0_17, %c0_18], %19 {strides = array<i32>} : memref<1x128xf32, #tpu.memory_space<vmem>>, vector<1x128xf32>,
    } else {
    }
    %c0_i32_11 = arith.constant 0 : i32
    %14 = arith.cmpi eq, %arg2, %c0_i32_11 : i32
    %15 = arith.extui %14 : i1 to i32
    %c0_i32_12 = arith.constant 0 : i32
    %16 = arith.cmpi ne, %15, %c0_i32_12 : i32
    scf.if %16 {
      %c0_13 = arith.constant 0 : index
      %c0_14 = arith.constant 0 : index
      %17 = vector.load %arg5[%c0_13, %c0_14] : memref<112x128xf32, #tpu.memory_space<vmem>>, vector<112x128xf32>
      %c0_15 = arith.constant 0 : index
      %c0_16 = arith.constant 0 : index
      %18 = vector.load %arg6[%c0_15, %c0_16] : memref<1x128xf32, #tpu.memory_space<vmem>>, vector<1x128xf32>
      %cst_17 = arith.constant dense<0.000000e+00> : vector<128xf32>
      %19 = vector.multi_reduction <add>, %17, %cst_17 [0] : vector<112x128xf32> to vector<128xf32>
      %20 = vector.shape_cast %19 : vector<128xf32> to vector<1x128xf32>
      %21 = arith.addf %18, %20 : vector<1x128xf32>
      %c0_18 = arith.constant 0 : index
      %c0_19 = arith.constant 0 : index
      %22 = vector.load %arg6[%c0_18, %c0_19] : memref<1x128xf32, #tpu.memory_space<vmem>>, vector<1x128xf32>
      tpu.vector_store %arg6[%c0_18, %c0_19], %21 {strides = array<i32>} : memref<1x128xf32, #tpu.memory_space<vmem>>, vector<1x128xf32>,
      %c0_20 = arith.constant 0 : index
      %c0_21 = arith.constant 0 : index
      %23 = vector.load %arg7[%c0_20, %c0_21] : memref<1x128xf32, #tpu.memory_space<vmem>>, vector<1x128xf32>
      %24 = arith.mulf %17, %17 : vector<112x128xf32>
      %cst_22 = arith.constant dense<0.000000e+00> : vector<128xf32>
      %25 = vector.multi_reduction <add>, %24, %cst_22 [0] : vector<112x128xf32> to vector<128xf32>
      %26 = vector.shape_cast %25 : vector<128xf32> to vector<1x128xf32>
      %27 = arith.addf %23, %26 : vector<1x128xf32>
      %c0_23 = arith.constant 0 : index
      %c0_24 = arith.constant 0 : index
      %28 = vector.load %arg7[%c0_23, %c0_24] : memref<1x128xf32, #tpu.memory_space<vmem>>, vector<1x128xf32>
      tpu.vector_store %arg7[%c0_23, %c0_24], %27 {strides = array<i32>} : memref<1x128xf32, #tpu.memory_space<vmem>>, vector<1x128xf32>,
    } else {
    }
    return
  }
  func.func @transform_0(%arg0: i32, %arg1: i32, %arg2: i32) -> (i32, i32) {
    %c0_i32 = arith.constant 0 : i32
    return %arg1, %arg2 : i32, i32
  }
  func.func @transform_1(%arg0: i32, %arg1: i32, %arg2: i32) -> (i32, i32) {
    %c0_i32 = arith.constant 0 : i32
    return %arg2, %arg0 : i32, i32
  }
  func.func @transform_2(%arg0: i32, %arg1: i32, %arg2: i32) -> (i32, i32) {
    %c0_i32 = arith.constant 0 : i32
    return %arg1, %arg0 : i32, i32
  }
  func.func @transform_3(%arg0: i32, %arg1: i32, %arg2: i32) -> (i32, i32) {
    %c0_i32 = arith.constant 0 : i32
    %c0_i32_0 = arith.constant 0 : i32
    return %c0_i32, %arg0 : i32, i32
  }
  func.func @transform_4(%arg0: i32, %arg1: i32, %arg2: i32) -> (i32, i32) {
    %c0_i32 = arith.constant 0 : i32
    %c0_i32_0 = arith.constant 0 : i32
    return %c0_i32, %arg0 : i32, i32
  }
}

module attributes {stable_mosaic.version = 11 : i64} {
  func.func @_residual_affine_relu_kernel(%arg0: i32, %arg1: i32, %arg2: memref<112x128xf32, #tpu.memory_space<vmem>>, %arg3: memref<1x128xf32, #tpu.memory_space<vmem>>, %arg4: memref<1x128xf32, #tpu.memory_space<vmem>>, %arg5: memref<112x128xf32, #tpu.memory_space<vmem>>, %arg6: memref<1x128xf32, #tpu.memory_space<vmem>>, %arg7: memref<1x128xf32, #tpu.memory_space<vmem>>, %arg8: memref<112x128xf32, #tpu.memory_space<vmem>>) attributes {dimension_semantics = [#tpu.dimension_semantics<parallel>, #tpu.dimension_semantics<parallel>], iteration_bounds = array<i64: 1, 1>, scalar_prefetch = 0 : i64, scratch_operands = 0 : i64, tpu.core_type = #tpu.core_type<tc>, window_params = [{transform_indices = @transform_0, window_bounds = array<i64: 112, 128>}, {transform_indices = @transform_1, window_bounds = array<i64: 1, 128>}, {transform_indices = @transform_2, window_bounds = array<i64: 1, 128>}, {transform_indices = @transform_3, window_bounds = array<i64: 112, 128>}, {transform_indices = @transform_4, window_bounds = array<i64: 1, 128>}, {transform_indices = @transform_5, window_bounds = array<i64: 1, 128>}, {transform_indices = @transform_6, window_bounds = array<i64: 112, 128>}]} {
    %c0 = arith.constant 0 : index
    %c0_0 = arith.constant 0 : index
    %0 = vector.load %arg2[%c0, %c0_0] : memref<112x128xf32, #tpu.memory_space<vmem>>, vector<112x128xf32>
    %c0_1 = arith.constant 0 : index
    %c0_2 = arith.constant 0 : index
    %1 = vector.load %arg3[%c0_1, %c0_2] : memref<1x128xf32, #tpu.memory_space<vmem>>, vector<1x128xf32>
    %2 = vector.broadcast %1 : vector<1x128xf32> to vector<112x128xf32>
    %3 = arith.mulf %0, %2 : vector<112x128xf32>
    %c0_3 = arith.constant 0 : index
    %c0_4 = arith.constant 0 : index
    %4 = vector.load %arg4[%c0_3, %c0_4] : memref<1x128xf32, #tpu.memory_space<vmem>>, vector<1x128xf32>
    %5 = vector.broadcast %4 : vector<1x128xf32> to vector<112x128xf32>
    %6 = arith.addf %3, %5 : vector<112x128xf32>
    %c0_5 = arith.constant 0 : index
    %c0_6 = arith.constant 0 : index
    %7 = vector.load %arg5[%c0_5, %c0_6] : memref<112x128xf32, #tpu.memory_space<vmem>>, vector<112x128xf32>
    %c0_7 = arith.constant 0 : index
    %c0_8 = arith.constant 0 : index
    %8 = vector.load %arg6[%c0_7, %c0_8] : memref<1x128xf32, #tpu.memory_space<vmem>>, vector<1x128xf32>
    %9 = vector.broadcast %8 : vector<1x128xf32> to vector<112x128xf32>
    %10 = arith.mulf %7, %9 : vector<112x128xf32>
    %11 = arith.addf %6, %10 : vector<112x128xf32>
    %c0_9 = arith.constant 0 : index
    %c0_10 = arith.constant 0 : index
    %12 = vector.load %arg7[%c0_9, %c0_10] : memref<1x128xf32, #tpu.memory_space<vmem>>, vector<1x128xf32>
    %13 = vector.broadcast %12 : vector<1x128xf32> to vector<112x128xf32>
    %14 = arith.addf %11, %13 : vector<112x128xf32>
    %cst = arith.constant 0.000000e+00 : f32
    %15 = vector.broadcast %cst : f32 to vector<112x128xf32>
    %16 = arith.maximumf %14, %15 : vector<112x128xf32>
    %c0_11 = arith.constant 0 : index
    %c0_12 = arith.constant 0 : index
    %17 = vector.load %arg8[%c0_11, %c0_12] : memref<112x128xf32, #tpu.memory_space<vmem>>, vector<112x128xf32>
    tpu.vector_store %arg8[%c0_11, %c0_12], %16 {strides = array<i32>} : memref<112x128xf32, #tpu.memory_space<vmem>>, vector<112x128xf32>,
    return
  }
  func.func @transform_0(%arg0: i32, %arg1: i32) -> (i32, i32) {
    %c0_i32 = arith.constant 0 : i32
    return %arg0, %arg1 : i32, i32
  }
  func.func @transform_1(%arg0: i32, %arg1: i32) -> (i32, i32) {
    %c0_i32 = arith.constant 0 : i32
    %c0_i32_0 = arith.constant 0 : i32
    return %c0_i32, %arg1 : i32, i32
  }
  func.func @transform_2(%arg0: i32, %arg1: i32) -> (i32, i32) {
    %c0_i32 = arith.constant 0 : i32
    %c0_i32_0 = arith.constant 0 : i32
    return %c0_i32, %arg1 : i32, i32
  }
  func.func @transform_3(%arg0: i32, %arg1: i32) -> (i32, i32) {
    %c0_i32 = arith.constant 0 : i32
    return %arg0, %arg1 : i32, i32
  }
  func.func @transform_4(%arg0: i32, %arg1: i32) -> (i32, i32) {
    %c0_i32 = arith.constant 0 : i32
    %c0_i32_0 = arith.constant 0 : i32
    return %c0_i32, %arg1 : i32, i32
  }
  func.func @transform_5(%arg0: i32, %arg1: i32) -> (i32, i32) {
    %c0_i32 = arith.constant 0 : i32
    %c0_i32_0 = arith.constant 0 : i32
    return %c0_i32, %arg1 : i32, i32
  }
  func.func @transform_6(%arg0: i32, %arg1: i32) -> (i32, i32) {
    %c0_i32 = arith.constant 0 : i32
    return %arg0, %arg1 : i32, i32
  }
}

</mosaic_0001>

<bundles_post_ra>
// kernel: bottleneck_forward.8
= control target key start
LH: loop header
LB: loop body
LE: loop exit
PB: predicated region body
PF: predicated region fallthrough
CT: control target
= control target key end

     0   :  { %s1088_s0 = inlined_call_operand.vmem [shape: f32[400,128], index: 0, kind: input, shape index: {}]   ;;  %s1089_s1 = inlined_call_operand.vmem [shape: f32[1,128], index: 1, kind: input, shape index: {}]   ;;  %s1090_s2 = inlined_call_operand.vmem [shape: f32[1,128], index: 2, kind: input, shape index: {}]   ;;  %s1091_s3 = inlined_call_operand.vmem [shape: bf16[400,128], index: 3, kind: output, shape index: {}]  }
   0x1   :  { %v14_v0 = vld [vmem:[%s1088_s0] sm:$0xff]  ;;  %v15_v1 = vld [vmem:[%s1088_s0 + $0x8] sm:$0xff]  ;;  %v16_v6 = vld [vmem:[%s1088_s0 + $0x10] sm:$0xff] }
   0x2   :  { %v762_v2 = vld [vmem:[%s1089_s1] ss:$0 sm:$0xff]  ;;  %v17_v7 = vld [vmem:[%s1088_s0 + $0x18] sm:$0xff]  ;;  %v19_v11 = vld [vmem:[%s1088_s0 + $0x28] sm:$0xff] }
   0x3   :  { %v71_v3 = vmul.f32 %v762_v2, %v14_v0  ;;  %v72_v4 = vmul.f32 %v762_v2, %v15_v1  ;;  %v769_v5 = vld [vmem:[%s1090_s2] ss:$0 sm:$0xff]  ;;  %v73_v8 = vmul.f32 %v762_v2, %v16_v6  ;;  %v74_v9 = vmul.f32 %v762_v2, %v17_v7  ;;  %v20_v12 = vld [vmem:[%s1088_s0 + $0x30] sm:$0xff]  ;;  %v21_v17 = vld [vmem:[%s1088_s0 + $0x38] sm:$0xff] }
   0x4   :  { %v18_v10 = vld [vmem:[%s1088_s0 + $0x20] sm:$0xff]  ;;  %v76_v16 = vmul.f32 %v762_v2, %v19_v11  ;;  %v77_v20 = vmul.f32 %v762_v2, %v20_v12  ;;  %v78_v21 = vmul.f32 %v762_v2, %v21_v17  ;;  %v23_v27 = vld [vmem:[%s1088_s0 + $0x48] sm:$0xff]  ;;  %v24_v32 = vld [vmem:[%s1088_s0 + $0x50] sm:$0xff] }
   0x5   :  { %v128_v13 = vadd.f32 %v769_v5, %v71_v3  ;;  %v129_v14 = vadd.f32 %v769_v5, %v72_v4  ;;  %v75_v15 = vmul.f32 %v762_v2, %v18_v10  ;;  %v130_v18 = vadd.f32 %v769_v5, %v73_v8  ;;  %v22_v22 = vld [vmem:[%s1088_s0 + $0x40] sm:$0xff]  ;;  %v25_v33 = vld [vmem:[%s1088_s0 + $0x58] sm:$0xff]  ;;  %v27_v39 = vld [vmem:[%s1088_s0 + $0x68] sm:$0xff] }
   0x6   :  { %v131_v19 = vadd.f32 %v769_v5, %v74_v9  ;;  %v133_v26 = vadd.f32 %v769_v5, %v76_v16  ;;  %v134_v30 = vadd.f32 %v769_v5, %v77_v20  ;;  %v135_v31 = vadd.f32 %v769_v5, %v78_v21  ;;  %v26_v38 = vld [vmem:[%s1088_s0 + $0x60] sm:$0xff]  ;;  %v28_v44 = vld [vmem:[%s1088_s0 + $0x70] sm:$0xff]  ;;  %v29_v49 = vld [vmem:[%s1088_s0 + $0x78] sm:$0xff] }
   0x7   :  { %v178_v23 = vmax.f32 %v128_v13, 0.0  ;;  %v179_v24 = vmax.f32 %v129_v14, 0.0  ;;  %v132_v25 = vadd.f32 %v769_v5, %v75_v15  ;;  %v180_v28 = vmax.f32 %v130_v18, 0.0  ;;  %v30_v54 = vld [vmem:[%s1088_s0 + $0x80] sm:$0xff]  ;;  %v31_v63 = vld [vmem:[%s1088_s0 + $0x88] sm:$0xff]  ;;  %v32_v6 = vld [vmem:[%s1088_s0 + $0x90] sm:$0xff] }
   0x8   :  { %v181_v29 = vmax.f32 %v131_v19, 0.0  ;;  %v183_v36 = vmax.f32 %v133_v26, 0.0  ;;  %v79_v37 = vmul.f32 %v762_v2, %v22_v22  ;;  %v184_v41 = vmax.f32 %v134_v30, 0.0  ;;  %v33_v7 = vld [vmem:[%s1088_s0 + $0x98] sm:$0xff]  ;;  %v34_v12 = vld [vmem:[%s1088_s0 + $0xa0] sm:$0xff]  ;;  %v35_v13 = vld [vmem:[%s1088_s0 + $0xa8] sm:$0xff] }
   0x9   :  { %v587_v34 = vpack.c.bf16 %v179_v24, %v178_v23  ;;  %v182_v35 = vmax.f32 %v132_v25, 0.0  ;;  %v185_v42 = vmax.f32 %v135_v31, 0.0  ;;  %v80_v43 = vmul.f32 %v762_v2, %v23_v27  ;;  %v36_v18 = vld [vmem:[%s1088_s0 + $0xb0] sm:$0xff]  ;;  %v37_v23 = vld [vmem:[%s1088_s0 + $0xb8] sm:$0xff] }
   0xa   :  { %v592_v40 = vpack.c.bf16 %v181_v29, %v180_v28  ;;  %v136_v46 = vadd.f32 %v769_v5, %v79_v37  ;;  %v81_v47 = vmul.f32 %v762_v2, %v24_v32  ;;  %v82_v48 = vmul.f32 %v762_v2, %v25_v33  ;;  %v38_v28 = vld [vmem:[%s1088_s0 + $0xc0] sm:$0xff]  ;;  %v39_v37 = vld [vmem:[%s1088_s0 + $0xc8] sm:$0xff] }
   0xb   :  { %588 = vst [vmem:[%s1091_s3] sm:$0xff] %v587_v34   ;;  %v597_v45 = vpack.c.bf16 %v183_v36, %v182_v35  ;;  %v602_v50 = vpack.c.bf16 %v185_v42, %v184_v41  ;;  %v137_v51 = vadd.f32 %v769_v5, %v80_v43  ;;  %v83_v52 = vmul.f32 %v762_v2, %v26_v38  ;;  %v40_v42 = vld [vmem:[%s1088_s0 + $0xd0] sm:$0xff]  ;;  %v41_v43 = vld [vmem:[%s1088_s0 + $0xd8] sm:$0xff] }
   0xc   :  { %709 = vst [vmem:[%s1091_s3 + $0x8] sm:$0xff] %v592_v40   ;;  %v84_v53 = vmul.f32 %v762_v2, %v27_v39  ;;  %v186_v55 = vmax.f32 %v136_v46, 0.0  ;;  %v138_v56 = vadd.f32 %v769_v5, %v81_v47  ;;  %v139_v57 = vadd.f32 %v769_v5, %v82_v48  ;;  %v42_v48 = vld [vmem:[%s1088_s0 + $0xe0] sm:$0xff] }
   0xd   :  { %710 = vst [vmem:[%s1091_s3 + $0x10] sm:$0xff] %v597_v45   ;;  %v85_v58 = vmul.f32 %v762_v2, %v28_v44  ;;  %711 = vst [vmem:[%s1091_s3 + $0x18] sm:$0xff] %v602_v50   ;;  %v187_v59 = vmax.f32 %v137_v51, 0.0  ;;  %v140_v60 = vadd.f32 %v769_v5, %v83_v52  ;;  %v86_v62 = vmul.f32 %v762_v2, %v29_v49  ;;  %v43_v49 = vld [vmem:[%s1088_s0 + $0xe8] sm:$0xff] }
   0xe   :  { %v141_v61 = vadd.f32 %v769_v5, %v84_v53  ;;  %v188_v0 = vmax.f32 %v138_v56, 0.0  ;;  %v189_v1 = vmax.f32 %v139_v57, 0.0  ;;  %v87_v4 = vmul.f32 %v762_v2, %v30_v54  ;;  %v44_v54 = vld [vmem:[%s1088_s0 + $0xf0] sm:$0xff] }
   0xf   :  { %v142_v3 = vadd.f32 %v769_v5, %v85_v58  ;;  %v607_v8 = vpack.c.bf16 %v187_v59, %v186_v55  ;;  %v190_v9 = vmax.f32 %v140_v60, 0.0  ;;  %v143_v11 = vadd.f32 %v769_v5, %v86_v62  ;;  %v45_v59 = vld [vmem:[%s1088_s0 + $0xf8] sm:$0xff] }
  0x10   :  { %v191_v10 = vmax.f32 %v141_v61, 0.0  ;;  %v612_v14 = vpack.c.bf16 %v189_v1, %v188_v0  ;;  %v88_v16 = vmul.f32 %v762_v2, %v31_v63  ;;  %v144_v17 = vadd.f32 %v769_v5, %v87_v4  ;;  %v46_v0 = vld [vmem:[%s1088_s0 + $0x100] sm:$0xff] }
  0x11   :  { %v192_v15 = vmax.f32 %v142_v3, 0.0  ;;  %712 = vst [vmem:[%s1091_s3 + $0x20] sm:$0xff] %v607_v8   ;;  %v193_v20 = vmax.f32 %v143_v11, 0.0  ;;  %v89_v21 = vmul.f32 %v762_v2, %v32_v6  ;;  %v90_v22 = vmul.f32 %v762_v2, %v33_v7  ;;  %v47_v11 = vld [vmem:[%s1088_s0 + $0x108] sm:$0xff] }
  0x12   :  { %v617_v19 = vpack.c.bf16 %v191_v10, %v190_v9  ;;  %713 = vst [vmem:[%s1091_s3 + $0x28] sm:$0xff] %v612_v14   ;;  %v145_v24 = vadd.f32 %v769_v5, %v88_v16  ;;  %v194_v25 = vmax.f32 %v144_v17, 0.0  ;;  %v91_v26 = vmul.f32 %v762_v2, %v34_v12  ;;  %v48_v16 = vld [vmem:[%s1088_s0 + $0x110] sm:$0xff]  ;;  %v49_v17 = vld [vmem:[%s1088_s0 + $0x118] sm:$0xff] }
  0x13   :  { %v92_v27 = vmul.f32 %v762_v2, %v35_v13  ;;  %v622_v29 = vpack.c.bf16 %v193_v20, %v192_v15  ;;  %v146_v30 = vadd.f32 %v769_v5, %v89_v21  ;;  %v147_v31 = vadd.f32 %v769_v5, %v90_v22  ;;  %v50_v22 = vld [vmem:[%s1088_s0 + $0x120] sm:$0xff] }
  0x14   :  { %714 = vst [vmem:[%s1091_s3 + $0x30] sm:$0xff] %v617_v19   ;;  %v93_v32 = vmul.f32 %v762_v2, %v36_v18  ;;  %v195_v33 = vmax.f32 %v145_v24, 0.0  ;;  %v148_v34 = vadd.f32 %v769_v5, %v91_v26  ;;  %v94_v36 = vmul.f32 %v762_v2, %v37_v23  ;;  %v51_v23 = vld [vmem:[%s1088_s0 + $0x128] sm:$0xff] }
  0x15   :  { %v149_v35 = vadd.f32 %v769_v5, %v92_v27  ;;  %715 = vst [vmem:[%s1091_s3 + $0x38] sm:$0xff] %v622_v29   ;;  %v196_v38 = vmax.f32 %v146_v30, 0.0  ;;  %v197_v39 = vmax.f32 %v147_v31, 0.0  ;;  %v95_v41 = vmul.f32 %v762_v2, %v38_v28  ;;  %v52_v28 = vld [vmem:[%s1088_s0 + $0x130] sm:$0xff] }
  0x16   :  { %v150_v40 = vadd.f32 %v769_v5, %v93_v32  ;;  %v627_v44 = vpack.c.bf16 %v195_v33, %v194_v25  ;;  %v198_v45 = vmax.f32 %v148_v34, 0.0  ;;  %v151_v47 = vadd.f32 %v769_v5, %v94_v36  ;;  %v53_v33 = vld [vmem:[%s1088_s0 + $0x138] sm:$0xff] }
  0x17   :  { %v199_v46 = vmax.f32 %v149_v35, 0.0  ;;  %v632_v50 = vpack.c.bf16 %v197_v39, %v196_v38  ;;  %v96_v52 = vmul.f32 %v762_v2, %v39_v37  ;;  %v152_v53 = vadd.f32 %v769_v5, %v95_v41  ;;  %v54_v38 = vld [vmem:[%s1088_s0 + $0x140] sm:$0xff] }
  0x18   :  { %v200_v51 = vmax.f32 %v150_v40, 0.0  ;;  %716 = vst [vmem:[%s1091_s3 + $0x40] sm:$0xff] %v627_v44   ;;  %v201_v56 = vmax.f32 %v151_v47, 0.0  ;;  %v97_v57 = vmul.f32 %v762_v2, %v40_v42  ;;  %v98_v58 = vmul.f32 %v762_v2, %v41_v43  ;;  %v55_v47 = vld [vmem:[%s1088_s0 + $0x148] sm:$0xff] }
  0x19   :  { %v637_v55 = vpack.c.bf16 %v199_v46, %v198_v45  ;;  %717 = vst [vmem:[%s1091_s3 + $0x48] sm:$0xff] %v632_v50   ;;  %v153_v60 = vadd.f32 %v769_v5, %v96_v52  ;;  %v202_v61 = vmax.f32 %v152_v53, 0.0  ;;  %v99_v62 = vmul.f32 %v762_v2, %v42_v48  ;;  %v56_v52 = vld [vmem:[%s1088_s0 + $0x150] sm:$0xff]  ;;  %v57_v53 = vld [vmem:[%s1088_s0 + $0x158] sm:$0xff] }
  0x1a   :  { %v100_v63 = vmul.f32 %v762_v2, %v43_v49  ;;  %v642_v1 = vpack.c.bf16 %v201_v56, %v200_v51  ;;  %v154_v3 = vadd.f32 %v769_v5, %v97_v57  ;;  %v155_v4 = vadd.f32 %v769_v5, %v98_v58  ;;  %v58_v58 = vld [vmem:[%s1088_s0 + $0x160] sm:$0xff] }
  0x1b   :  { %718 = vst [vmem:[%s1091_s3 + $0x50] sm:$0xff] %v637_v55   ;;  %v101_v6 = vmul.f32 %v762_v2, %v44_v54  ;;  %v203_v7 = vmax.f32 %v153_v60, 0.0  ;;  %v156_v8 = vadd.f32 %v769_v5, %v99_v62  ;;  %v102_v10 = vmul.f32 %v762_v2, %v45_v59  ;;  %v59_v59 = vld [vmem:[%s1088_s0 + $0x168] sm:$0xff] }
  0x1c   :  { %v157_v9 = vadd.f32 %v769_v5, %v100_v63  ;;  %719 = vst [vmem:[%s1091_s3 + $0x58] sm:$0xff] %v642_v1   ;;  %v204_v12 = vmax.f32 %v154_v3, 0.0  ;;  %v205_v13 = vmax.f32 %v155_v4, 0.0  ;;  %v103_v15 = vmul.f32 %v762_v2, %v46_v0  ;;  %v60_v0 = vld [vmem:[%s1088_s0 + $0x170] sm:$0xff] }
  0x1d   :  { %v158_v14 = vadd.f32 %v769_v5, %v101_v6  ;;  %v647_v18 = vpack.c.bf16 %v203_v7, %v202_v61  ;;  %v206_v19 = vmax.f32 %v156_v8, 0.0  ;;  %v159_v21 = vadd.f32 %v769_v5, %v102_v10  ;;  %v61_v7 = vld [vmem:[%s1088_s0 + $0x178] sm:$0xff] }
  0x1e   :  { %v207_v20 = vmax.f32 %v157_v9, 0.0  ;;  %v652_v24 = vpack.c.bf16 %v205_v13, %v204_v12  ;;  %v104_v26 = vmul.f32 %v762_v2, %v47_v11  ;;  %v160_v27 = vadd.f32 %v769_v5, %v103_v15  ;;  %v62_v12 = vld [vmem:[%s1088_s0 + $0x180] sm:$0xff] }
  0x1f   :  { %v208_v25 = vmax.f32 %v158_v14, 0.0  ;;  %720 = vst [vmem:[%s1091_s3 + $0x60] sm:$0xff] %v647_v18   ;;  %v209_v30 = vmax.f32 %v159_v21, 0.0  ;;  %v105_v31 = vmul.f32 %v762_v2, %v48_v16  ;;  %v106_v32 = vmul.f32 %v762_v2, %v49_v17  ;;  %v63_v21 = vld [vmem:[%s1088_s0 + $0x188] sm:$0xff] }
  0x20   :  { %v657_v29 = vpack.c.bf16 %v207_v20, %v206_v19  ;;  %721 = vst [vmem:[%s1091_s3 + $0x68] sm:$0xff] %v652_v24   ;;  %v161_v34 = vadd.f32 %v769_v5, %v104_v26  ;;  %v210_v35 = vmax.f32 %v160_v27, 0.0  ;;  %v107_v36 = vmul.f32 %v762_v2, %v50_v22 }
  0x21   :  { %v108_v37 = vmul.f32 %v762_v2, %v51_v23  ;;  %v662_v39 = vpack.c.bf16 %v209_v30, %v208_v25  ;;  %v162_v40 = vadd.f32 %v769_v5, %v105_v31  ;;  %v163_v41 = vadd.f32 %v769_v5, %v106_v32 }
  0x22   :  { %722 = vst [vmem:[%s1091_s3 + $0x70] sm:$0xff] %v657_v29   ;;  %v109_v42 = vmul.f32 %v762_v2, %v52_v28  ;;  %v211_v43 = vmax.f32 %v161_v34, 0.0  ;;  %v164_v44 = vadd.f32 %v769_v5, %v107_v36  ;;  %v110_v46 = vmul.f32 %v762_v2, %v53_v33 }
  0x23   :  { %v165_v45 = vadd.f32 %v769_v5, %v108_v37  ;;  %723 = vst [vmem:[%s1091_s3 + $0x78] sm:$0xff] %v662_v39   ;;  %v212_v48 = vmax.f32 %v162_v40, 0.0  ;;  %v213_v49 = vmax.f32 %v163_v41, 0.0  ;;  %v111_v51 = vmul.f32 %v762_v2, %v54_v38 }
  0x24   :  { %v166_v50 = vadd.f32 %v769_v5, %v109_v42  ;;  %v667_v54 = vpack.c.bf16 %v211_v43, %v210_v35  ;;  %v214_v55 = vmax.f32 %v164_v44, 0.0  ;;  %v167_v57 = vadd.f32 %v769_v5, %v110_v46 }
  0x25   :  { %v215_v56 = vmax.f32 %v165_v45, 0.0  ;;  %v672_v60 = vpack.c.bf16 %v213_v49, %v212_v48  ;;  %v112_v62 = vmul.f32 %v762_v2, %v55_v47  ;;  %v168_v63 = vadd.f32 %v769_v5, %v111_v51 }
  0x26   :  { %v216_v61 = vmax.f32 %v166_v50, 0.0  ;;  %724 = vst [vmem:[%s1091_s3 + $0x80] sm:$0xff] %v667_v54   ;;  %v217_v3 = vmax.f32 %v167_v57, 0.0  ;;  %v113_v4 = vmul.f32 %v762_v2, %v56_v52  ;;  %v114_v6 = vmul.f32 %v762_v2, %v57_v53 }
  0x27   :  { %v677_v1 = vpack.c.bf16 %v215_v56, %v214_v55  ;;  %725 = vst [vmem:[%s1091_s3 + $0x88] sm:$0xff] %v672_v60   ;;  %v169_v8 = vadd.f32 %v769_v5, %v112_v62  ;;  %v218_v9 = vmax.f32 %v168_v63, 0.0  ;;  %v115_v10 = vmul.f32 %v762_v2, %v58_v58 }
  0x28   :  { %v116_v11 = vmul.f32 %v762_v2, %v59_v59  ;;  %v682_v13 = vpack.c.bf16 %v217_v3, %v216_v61  ;;  %v170_v14 = vadd.f32 %v769_v5, %v113_v4  ;;  %v171_v15 = vadd.f32 %v769_v5, %v114_v6 }
  0x29   :  { %726 = vst [vmem:[%s1091_s3 + $0x90] sm:$0xff] %v677_v1   ;;  %v117_v16 = vmul.f32 %v762_v2, %v60_v0  ;;  %v219_v17 = vmax.f32 %v169_v8, 0.0  ;;  %v172_v18 = vadd.f32 %v769_v5, %v115_v10  ;;  %v118_v20 = vmul.f32 %v762_v2, %v61_v7 }
  0x2a   :  { %v173_v19 = vadd.f32 %v769_v5, %v116_v11  ;;  %727 = vst [vmem:[%s1091_s3 + $0x98] sm:$0xff] %v682_v13   ;;  %v220_v22 = vmax.f32 %v170_v14, 0.0  ;;  %v221_v23 = vmax.f32 %v171_v15, 0.0  ;;  %v119_v25 = vmul.f32 %v762_v2, %v62_v12 }
  0x2b   :  { %v174_v24 = vadd.f32 %v769_v5, %v117_v16  ;;  %v687_v26 = vpack.c.bf16 %v219_v17, %v218_v9  ;;  %v222_v27 = vmax.f32 %v172_v18, 0.0  ;;  %v175_v29 = vadd.f32 %v769_v5, %v118_v20 }
  0x2c   :  { %v223_v28 = vmax.f32 %v173_v19, 0.0  ;;  %v692_v30 = vpack.c.bf16 %v221_v23, %v220_v22  ;;  %v120_v32 = vmul.f32 %v762_v2, %v63_v21  ;;  %v176_v33 = vadd.f32 %v769_v5, %v119_v25 }
  0x2d   :  { %v224_v31 = vmax.f32 %v174_v24, 0.0  ;;  %728 = vst [vmem:[%s1091_s3 + $0xa0] sm:$0xff] %v687_v26   ;;  %v225_v35 = vmax.f32 %v175_v29, 0.0 }
  0x2e   :  { %v697_v34 = vpack.c.bf16 %v223_v28, %v222_v27  ;;  %729 = vst [vmem:[%s1091_s3 + $0xa8] sm:$0xff] %v692_v30   ;;  %v177_v36 = vadd.f32 %v769_v5, %v120_v32  ;;  %v226_v37 = vmax.f32 %v176_v33, 0.0 }
  0x2f   :  { %v702_v2 = vpack.c.bf16 %v225_v35, %v224_v31 }
  0x30   :  { %730 = vst [vmem:[%s1091_s3 + $0xb0] sm:$0xff] %v697_v34   ;;  %v227_v38 = vmax.f32 %v177_v36, 0.0 }
  0x31   :  { %731 = vst [vmem:[%s1091_s3 + $0xb8] sm:$0xff] %v702_v2  }
  0x32   :  { %v707_v39 = vpack.c.bf16 %v227_v38, %v226_v37 }
  0x34   :  { %732 = vst [vmem:[%s1091_s3 + $0xc0] sm:$0xff] %v707_v39  }

// kernel: bottleneck_forward.7
= control target key start
LH: loop header
LB: loop body
LE: loop exit
PB: predicated region body
PF: predicated region fallthrough
CT: control target
= control target key end

     0   :  { %v1187_v0 = vmov 0.0   ;;  %vm1188_vm0 = vmmov 0   ;;  %s1693_s1 = inlined_call_operand.vmem [shape: bf16[128,128], index: 1, kind: input, shape index: {}]   ;;  %s1694_s0 = inlined_call_operand.vmem [shape: bf16[400,128], index: 0, kind: input, shape index: {}]   ;;  %s1695_s2 = inlined_call_operand.vmem [shape: f32[400,128], index: 2, kind: output, shape index: {0}]   ;;  %s1696_s3 = inlined_call_operand.vmem [shape: f32[1,128], index: 3, kind: output, shape index: {1}]   ;;  %s1697_s4 = inlined_call_operand.vmem [shape: f32[1,128], index: 4, kind: output, shape index: {2}]  }
   0x1   :  { %1020 = vmatprep.subr.bf16.mxu0 %v1187_v0  ;;  %v1154_v1 = vld [vmem:[%s1693_s1] sm:$0xff]   ;;  %1036 = vmatprep.mubr.msk.bf16.mxu0 %vm1188_vm0, %v1187_v0  ;;  %v1155_v2 = vld [vmem:[%s1693_s1 + $0x8] sm:$0xff]   ;;  %v1156_v3 = vld [vmem:[%s1693_s1 + $0x10] sm:$0xff]   ;;  %721 = vst [vmem:[%s1696_s3] sm:$0x1] %v1187_v0 }
   0x2   :  { %1136 = vmatprep.subr.bf16.mxu1 %v1187_v0  ;;  %1088 = vmatprep.mubr.msk.bf16.mxu1 %vm1188_vm0, %v1187_v0  ;;  %v1157_v4 = vld [vmem:[%s1693_s1 + $0x18] sm:$0xff]   ;;  %v1158_v5 = vld [vmem:[%s1693_s1 + $0x20] sm:$0xff]   ;;  %v1159_v6 = vld [vmem:[%s1693_s1 + $0x28] sm:$0xff]   ;;  %722 = vst [vmem:[%s1697_s4] sm:$0x1] %v1187_v0 }
   0x3   :  { %1021 = vmatpush3.bf16.msra.mxu0 %v1154_v1  ;;  %1144 = vmatpush3.bf16.msra.mxu1 %v1154_v1  ;;  %v1160_v7 = vld [vmem:[%s1693_s1 + $0x30] sm:$0xff]   ;;  %v1161_v8 = vld [vmem:[%s1693_s1 + $0x38] sm:$0xff]   ;;  %v1162_v9 = vld [vmem:[%s1694_s0] sm:$0xff]  }
   0x4   :  { %1022 = vmatprep.subr.bf16.mxu0 %v1187_v0  ;;  %1137 = vmatprep.subr.bf16.mxu1 %v1187_v0  ;;  %v1169_v10 = vld [vmem:[%s1694_s0 + $0x68] sm:$0xff]   ;;  %v1171_v12 = vld [vmem:[%s1694_s0 + $0x70] sm:$0xff]   ;;  %v1173_v14 = vld [vmem:[%s1694_s0 + $0x78] sm:$0xff]  }
   0x5   :  { %v1163_v11 = vld [vmem:[%s1694_s0 + $0x8] sm:$0xff]   ;;  %v1164_v13 = vld [vmem:[%s1694_s0 + $0x10] sm:$0xff]   ;;  %v1165_v15 = vld [vmem:[%s1694_s0 + $0x18] sm:$0xff]  }
   0x6   :  { %v1175_v16 = vld [vmem:[%s1694_s0 + $0x80] sm:$0xff]   ;;  %v1177_v18 = vld [vmem:[%s1694_s0 + $0x88] sm:$0xff]   ;;  %v1179_v20 = vld [vmem:[%s1694_s0 + $0x90] sm:$0xff]  }
   0x7   :  { %1023 = vmatpush3.bf16.msra.mxu0 %v1155_v2  ;;  %1145 = vmatpush3.bf16.msra.mxu1 %v1155_v2  ;;  %v1166_v17 = vld [vmem:[%s1694_s0 + $0x20] sm:$0xff]   ;;  %v1167_v19 = vld [vmem:[%s1694_s0 + $0x28] sm:$0xff]   ;;  %v1168_v21 = vld [vmem:[%s1694_s0 + $0x30] sm:$0xff]  }
   0x8   :  { %1024 = vmatprep.subr.bf16.mxu0 %v1187_v0  ;;  %1138 = vmatprep.subr.bf16.mxu1 %v1187_v0  ;;  %v1181_v22 = vld [vmem:[%s1694_s0 + $0x98] sm:$0xff]   ;;  %v1182_v24 = vld [vmem:[%s1694_s0 + $0xa0] sm:$0xff]   ;;  %v1183_v26 = vld [vmem:[%s1694_s0 + $0xa8] sm:$0xff]  }
   0x9   :  { %v1170_v23 = vld [vmem:[%s1694_s0 + $0x38] sm:$0xff]   ;;  %v1172_v25 = vld [vmem:[%s1694_s0 + $0x40] sm:$0xff]   ;;  %v1174_v27 = vld [vmem:[%s1694_s0 + $0x48] sm:$0xff]  }
   0xa   :  { %v1184_v28 = vld [vmem:[%s1694_s0 + $0xb0] sm:$0xff]   ;;  %v1185_v30 = vld [vmem:[%s1694_s0 + $0xb8] sm:$0xff]   ;;  %v1186_v32 = vld [vmem:[%s1694_s0 + $0xc0] sm:$0xff]  }
   0xb   :  { %1025 = vmatpush3.bf16.msra.mxu0 %v1156_v3  ;;  %1146 = vmatpush3.bf16.msra.mxu1 %v1156_v3  ;;  %v1176_v29 = vld [vmem:[%s1694_s0 + $0x50] sm:$0xff]   ;;  %v1178_v31 = vld [vmem:[%s1694_s0 + $0x58] sm:$0xff]   ;;  %v1180_v33 = vld [vmem:[%s1694_s0 + $0x60] sm:$0xff]  }
   0xc   :  { %1026 = vmatprep.subr.bf16.mxu0 %v1187_v0  ;;  %1139 = vmatprep.subr.bf16.mxu1 %v1187_v0 }
   0xf   :  { %1027 = vmatpush3.bf16.msra.mxu0 %v1157_v4  ;;  %1147 = vmatpush3.bf16.msra.mxu1 %v1157_v4 }
  0x10   :  { %1028 = vmatprep.subr.bf16.mxu0 %v1187_v0  ;;  %1140 = vmatprep.subr.bf16.mxu1 %v1187_v0 }
  0x13   :  { %1029 = vmatpush3.bf16.msra.mxu0 %v1158_v5  ;;  %1148 = vmatpush3.bf16.msra.mxu1 %v1158_v5 }
  0x14   :  { %1030 = vmatprep.subr.bf16.mxu0 %v1187_v0  ;;  %1141 = vmatprep.subr.bf16.mxu1 %v1187_v0 }
  0x17   :  { %1031 = vmatpush3.bf16.msra.mxu0 %v1159_v6  ;;  %1149 = vmatpush3.bf16.msra.mxu1 %v1159_v6 }
  0x18   :  { %1032 = vmatprep.subr.bf16.mxu0 %v1187_v0  ;;  %1142 = vmatprep.subr.bf16.mxu1 %v1187_v0 }
  0x1b   :  { %1033 = vmatpush3.bf16.msra.mxu0 %v1160_v7  ;;  %1150 = vmatpush3.bf16.msra.mxu1 %v1160_v7 }
  0x1c   :  { %1034 = vmatprep.subr.bf16.mxu0 %v1187_v0  ;;  %1143 = vmatprep.subr.bf16.mxu1 %v1187_v0 }
  0x1f   :  { %1035 = vmatpush3.bf16.msra.mxu0 %v1161_v8  ;;  %1151 = vmatpush3.bf16.msra.mxu1 %v1161_v8 }
  0x22   :  { %1037 = vmatmul.mubr.bf16.vlgmr.msra.gmra.mrb[0].mxu0 %v1162_v9  ;;  %1089 = vmatmul.mubr.bf16.vlgmr.msra.gmra.mrb[0].mxu1 %v1169_v10 }
  0x23   :  { %1040 = vmatprep.mubr.msk.bf16.mxu0 %vm1188_vm0, %v1187_v0  ;;  %1092 = vmatprep.mubr.msk.bf16.mxu1 %vm1188_vm0, %v1187_v0 }
  0x2a   :  { %1041 = vmatmul.mubr.bf16.gmra.mrb[4].mxu0 %v1163_v11  ;;  %1093 = vmatmul.mubr.bf16.gmra.mrb[4].mxu1 %v1171_v12 }
  0x2b   :  { %1044 = vmatprep.mubr.msk.bf16.mxu0 %vm1188_vm0, %v1187_v0  ;;  %1096 = vmatprep.mubr.msk.bf16.mxu1 %vm1188_vm0, %v1187_v0 }
  0x32   :  { %1045 = vmatmul.mubr.bf16.gmra.mrb[8].mxu0 %v1164_v13  ;;  %1097 = vmatmul.mubr.bf16.gmra.mrb[8].mxu1 %v1173_v14 }
  0x33   :  { %1048 = vmatprep.mubr.msk.bf16.mxu0 %vm1188_vm0, %v1187_v0  ;;  %1100 = vmatprep.mubr.msk.bf16.mxu1 %vm1188_vm0, %v1187_v0 }
  0x3a   :  { %1049 = vmatmul.mubr.bf16.gmra.mrb[12].mxu0 %v1165_v15  ;;  %1101 = vmatmul.mubr.bf16.gmra.mrb[12].mxu1 %v1175_v16 }
  0x3b   :  { %1052 = vmatprep.mubr.msk.bf16.mxu0 %vm1188_vm0, %v1187_v0  ;;  %1104 = vmatprep.mubr.msk.bf16.mxu1 %vm1188_vm0, %v1187_v0 }
  0x42   :  { %1053 = vmatmul.mubr.bf16.gmra.mrb[16].mxu0 %v1166_v17  ;;  %1105 = vmatmul.mubr.bf16.gmra.mrb[16].mxu1 %v1177_v18 }
  0x43   :  { %1056 = vmatprep.mubr.msk.bf16.mxu0 %vm1188_vm0, %v1187_v0  ;;  %1108 = vmatprep.mubr.msk.bf16.mxu1 %vm1188_vm0, %v1187_v0 }
  0x4a   :  { %1057 = vmatmul.mubr.bf16.gmra.mrb[20].mxu0 %v1167_v19  ;;  %1109 = vmatmul.mubr.bf16.gmra.mrb[20].mxu1 %v1179_v20 }
  0x4b   :  { %1060 = vmatprep.mubr.msk.bf16.mxu0 %vm1188_vm0, %v1187_v0  ;;  %1112 = vmatprep.mubr.msk.bf16.mxu1 %vm1188_vm0, %v1187_v0 }
  0x52   :  { %1061 = vmatmul.mubr.bf16.gmra.mrb[24].mxu0 %v1168_v21  ;;  %1113 = vmatmul.mubr.bf16.gmra.mrb[24].mxu1 %v1181_v22 }
  0x53   :  { %1064 = vmatprep.mubr.msk.bf16.mxu0 %vm1188_vm0, %v1187_v0  ;;  %1116 = vmatprep.mubr.msk.bf16.mxu1 %vm1188_vm0, %v1187_v0 }
  0x5a   :  { %1065 = vmatmul.mubr.bf16.gmra.mrb[28].mxu0 %v1170_v23  ;;  %1117 = vmatmul.mubr.bf16.gmra.mrb[28].mxu1 %v1182_v24 }
  0x5b   :  { %1068 = vmatprep.mubr.msk.bf16.mxu0 %vm1188_vm0, %v1187_v0  ;;  %1120 = vmatprep.mubr.msk.bf16.mxu1 %vm1188_vm0, %v1187_v0 }
  0x62   :  { %1069 = vmatmul.mubr.bf16.gmra.mrb[32].mxu0 %v1172_v25  ;;  %1121 = vmatmul.mubr.bf16.gmra.mrb[32].mxu1 %v1183_v26 }
  0x63   :  { %1072 = vmatprep.mubr.msk.bf16.mxu0 %vm1188_vm0, %v1187_v0  ;;  %1124 = vmatprep.mubr.msk.bf16.mxu1 %vm1188_vm0, %v1187_v0 }
  0x6a   :  { %1073 = vmatmul.mubr.bf16.gmra.mrb[36].mxu0 %v1174_v27  ;;  %1125 = vmatmul.mubr.bf16.gmra.mrb[36].mxu1 %v1184_v28 }
  0x6b   :  { %1076 = vmatprep.mubr.msk.bf16.mxu0 %vm1188_vm0, %v1187_v0  ;;  %1128 = vmatprep.mubr.msk.bf16.mxu1 %vm1188_vm0, %v1187_v0 }
  0x72   :  { %1077 = vmatmul.mubr.bf16.gmra.mrb[40].mxu0 %v1176_v29  ;;  %1129 = vmatmul.mubr.bf16.gmra.mrb[40].mxu1 %v1185_v30 }
  0x73   :  { %1080 = vmatprep.mubr.msk.bf16.mxu0 %vm1188_vm0, %v1187_v0  ;;  %1132 = vmatprep.mubr.msk.bf16.mxu1 %vm1188_vm0, %v1187_v0 }
  0x7a   :  { %1081 = vmatmul.mubr.bf16.gmra.mrb[44].mxu0 %v1178_v31  ;;  %1133 = vmatmul.mubr.bf16.gmra.mrb[44].mxu1 %v1186_v32 }
  0x7b   :  { %1084 = vmatprep.mubr.msk.bf16.mxu0 %vm1188_vm0, %v1187_v0 }
  0x82   :  { %1085 = vmatmul.mubr.bf16.gmra.mrb[48].mxu0 %v1180_v33 }
  0xf5   :  { %v417_v34 = vpop.f32.mrb[0].mxu0  ;;  %v1379_v35 = vpop.f32.mrb[0].mxu1 }
  0xf6   :  { %v1038_v36 = vpop.f32.mrb[1].mxu0  ;;  %v1090_v37 = vpop.f32.mrb[1].mxu1  ;;  %666 = vst [vmem:[%s1695_s2] sm:$0xff] %v417_v34  ;;  %692 = vst [vmem:[%s1695_s2 + $0xd0] sm:$0xff] %v1379_v35  ;;  %v835_v42 = vmul.f32 %v417_v34, %v417_v34 }
  0xf7   :  { %v420_v38 = vpop.f32.mrb[2].mxu0  ;;  %v1381_v39 = vpop.f32.mrb[2].mxu1 }
  0xf8   :  { %v1039_v40 = vpop.f32.mrb[3].mxu0  ;;  %v1091_v41 = vpop.f32.mrb[3].mxu1  ;;  %667 = vst [vmem:[%s1695_s2 + $0x8] sm:$0xff] %v420_v38  ;;  %v777_v43 = vadd.f32 %v420_v38, %v417_v34  ;;  %v836_v44 = vmul.f32 %v420_v38, %v420_v38  ;;  %693 = vst [vmem:[%s1695_s2 + $0xd8] sm:$0xff] %v1381_v39 }
  0xfa   :  { %v885_v45 = vadd.f32 %v836_v44, %v835_v42 }
  0xfd   :  { %v425_v46 = vpop.f32.mrb[4].mxu0  ;;  %v1397_v47 = vpop.f32.mrb[4].mxu1 }
  0xfe   :  { %v1042_v48 = vpop.f32.mrb[5].mxu0  ;;  %v1094_v49 = vpop.f32.mrb[5].mxu1  ;;  %668 = vst [vmem:[%s1695_s2 + $0x10] sm:$0xff] %v425_v46  ;;  %v778_v52 = vadd.f32 %v777_v43, %v425_v46  ;;  %v837_v53 = vmul.f32 %v425_v46, %v425_v46  ;;  %694 = vst [vmem:[%s1695_s2 + $0xe0] sm:$0xff] %v1397_v47 }
  0xff   :  { %v428_v50 = vpop.f32.mrb[6].mxu0  ;;  %v1399_v51 = vpop.f32.mrb[6].mxu1 }
 0x100   :  { %v1043_v54 = vpop.f32.mrb[7].mxu0  ;;  %v1095_v55 = vpop.f32.mrb[7].mxu1  ;;  %v886_v56 = vadd.f32 %v885_v45, %v837_v53  ;;  %669 = vst [vmem:[%s1695_s2 + $0x18] sm:$0xff] %v428_v50  ;;  %v779_v57 = vadd.f32 %v778_v52, %v428_v50  ;;  %v838_v58 = vmul.f32 %v428_v50, %v428_v50  ;;  %695 = vst [vmem:[%s1695_s2 + $0xe8] sm:$0xff] %v1399_v51 }
 0x102   :  { %v887_v59 = vadd.f32 %v886_v56, %v838_v58 }
 0x105   :  { %v433_v60 = vpop.f32.mrb[8].mxu0  ;;  %v1415_v61 = vpop.f32.mrb[8].mxu1 }
 0x106   :  { %v1046_v62 = vpop.f32.mrb[9].mxu0  ;;  %v1098_v63 = vpop.f32.mrb[9].mxu1  ;;  %670 = vst [vmem:[%s1695_s2 + $0x20] sm:$0xff] %v433_v60  ;;  %v780_v3 = vadd.f32 %v779_v57, %v433_v60  ;;  %v839_v4 = vmul.f32 %v433_v60, %v433_v60  ;;  %696 = vst [vmem:[%s1695_s2 + $0xf0] sm:$0xff] %v1415_v61 }
 0x107   :  { %v436_v1 = vpop.f32.mrb[10].mxu0  ;;  %v1417_v2 = vpop.f32.mrb[10].mxu1 }
 0x108   :  { %v1047_v5 = vpop.f32.mrb[11].mxu0  ;;  %v1099_v6 = vpop.f32.mrb[11].mxu1  ;;  %v888_v7 = vadd.f32 %v887_v59, %v839_v4  ;;  %671 = vst [vmem:[%s1695_s2 + $0x28] sm:$0xff] %v436_v1  ;;  %v781_v8 = vadd.f32 %v780_v3, %v436_v1  ;;  %v840_v9 = vmul.f32 %v436_v1, %v436_v1  ;;  %697 = vst [vmem:[%s1695_s2 + $0xf8] sm:$0xff] %v1417_v2 }
 0x10a   :  { %v889_v10 = vadd.f32 %v888_v7, %v840_v9 }
 0x10d   :  { %v441_v11 = vpop.f32.mrb[12].mxu0  ;;  %v1441_v12 = vpop.f32.mrb[12].mxu1 }
 0x10e   :  { %v1050_v13 = vpop.f32.mrb[13].mxu0  ;;  %v1102_v14 = vpop.f32.mrb[13].mxu1  ;;  %672 = vst [vmem:[%s1695_s2 + $0x30] sm:$0xff] %v441_v11  ;;  %v782_v17 = vadd.f32 %v781_v8, %v441_v11  ;;  %v841_v18 = vmul.f32 %v441_v11, %v441_v11  ;;  %698 = vst [vmem:[%s1695_s2 + $0x100] sm:$0xff] %v1441_v12 }
 0x10f   :  { %v444_v15 = vpop.f32.mrb[14].mxu0  ;;  %v1443_v16 = vpop.f32.mrb[14].mxu1 }
 0x110   :  { %v1051_v19 = vpop.f32.mrb[15].mxu0  ;;  %v1103_v0 = vpop.f32.mrb[15].mxu1  ;;  %v890_v20 = vadd.f32 %v889_v10, %v841_v18  ;;  %673 = vst [vmem:[%s1695_s2 + $0x38] sm:$0xff] %v444_v15  ;;  %v783_v21 = vadd.f32 %v782_v17, %v444_v15  ;;  %v842_v22 = vmul.f32 %v444_v15, %v444_v15  ;;  %699 = vst [vmem:[%s1695_s2 + $0x108] sm:$0xff] %v1443_v16 }
 0x112   :  { %v891_v23 = vadd.f32 %v890_v20, %v842_v22 }
 0x115   :  { %v449_v24 = vpop.f32.mrb[16].mxu0  ;;  %v1459_v25 = vpop.f32.mrb[16].mxu1 }
 0x116   :  { %v1054_v26 = vpop.f32.mrb[17].mxu0  ;;  %v1106_v27 = vpop.f32.mrb[17].mxu1  ;;  %674 = vst [vmem:[%s1695_s2 + $0x40] sm:$0xff] %v449_v24  ;;  %v784_v30 = vadd.f32 %v783_v21, %v449_v24  ;;  %v843_v31 = vmul.f32 %v449_v24, %v449_v24  ;;  %700 = vst [vmem:[%s1695_s2 + $0x110] sm:$0xff] %v1459_v25 }
 0x117   :  { %v452_v28 = vpop.f32.mrb[18].mxu0  ;;  %v1461_v29 = vpop.f32.mrb[18].mxu1 }
 0x118   :  { %v1055_v32 = vpop.f32.mrb[19].mxu0  ;;  %v1107_v33 = vpop.f32.mrb[19].mxu1  ;;  %v892_v34 = vadd.f32 %v891_v23, %v843_v31  ;;  %675 = vst [vmem:[%s1695_s2 + $0x48] sm:$0xff] %v452_v28  ;;  %v785_v36 = vadd.f32 %v784_v30, %v452_v28  ;;  %v844_v37 = vmul.f32 %v452_v28, %v452_v28  ;;  %701 = vst [vmem:[%s1695_s2 + $0x118] sm:$0xff] %v1461_v29 }
 0x11a   :  { %v893_v38 = vadd.f32 %v892_v34, %v844_v37 }
 0x11d   :  { %v457_v40 = vpop.f32.mrb[20].mxu0  ;;  %v1477_v41 = vpop.f32.mrb[20].mxu1 }
 0x11e   :  { %v1058_v42 = vpop.f32.mrb[21].mxu0  ;;  %v1110_v43 = vpop.f32.mrb[21].mxu1  ;;  %676 = vst [vmem:[%s1695_s2 + $0x50] sm:$0xff] %v457_v40  ;;  %v786_v46 = vadd.f32 %v785_v36, %v457_v40  ;;  %v845_v48 = vmul.f32 %v457_v40, %v457_v40  ;;  %702 = vst [vmem:[%s1695_s2 + $0x120] sm:$0xff] %v1477_v41 }
 0x11f   :  { %v460_v44 = vpop.f32.mrb[22].mxu0  ;;  %v1479_v45 = vpop.f32.mrb[22].mxu1 }
 0x120   :  { %v1059_v49 = vpop.f32.mrb[23].mxu0  ;;  %v1111_v50 = vpop.f32.mrb[23].mxu1  ;;  %v894_v52 = vadd.f32 %v893_v38, %v845_v48  ;;  %677 = vst [vmem:[%s1695_s2 + $0x58] sm:$0xff] %v460_v44  ;;  %v787_v53 = vadd.f32 %v786_v46, %v460_v44  ;;  %v846_v54 = vmul.f32 %v460_v44, %v460_v44  ;;  %703 = vst [vmem:[%s1695_s2 + $0x128] sm:$0xff] %v1479_v45 }
 0x122   :  { %v895_v55 = vadd.f32 %v894_v52, %v846_v54 }
 0x125   :  { %v465_v56 = vpop.f32.mrb[24].mxu0  ;;  %v1495_v57 = vpop.f32.mrb[24].mxu1 }
 0x126   :  { %v1062_v58 = vpop.f32.mrb[25].mxu0  ;;  %v1114_v59 = vpop.f32.mrb[25].mxu1  ;;  %678 = vst [vmem:[%s1695_s2 + $0x60] sm:$0xff] %v465_v56  ;;  %v788_v63 = vadd.f32 %v787_v53, %v465_v56  ;;  %v847_v1 = vmul.f32 %v465_v56, %v465_v56  ;;  %704 = vst [vmem:[%s1695_s2 + $0x130] sm:$0xff] %v1495_v57 }
 0x127   :  { %v468_v60 = vpop.f32.mrb[26].mxu0  ;;  %v1497_v62 = vpop.f32.mrb[26].mxu1 }
 0x128   :  { %v1063_v3 = vpop.f32.mrb[27].mxu0  ;;  %v1115_v4 = vpop.f32.mrb[27].mxu1  ;;  %v896_v5 = vadd.f32 %v895_v55, %v847_v1  ;;  %679 = vst [vmem:[%s1695_s2 + $0x68] sm:$0xff] %v468_v60  ;;  %v789_v6 = vadd.f32 %v788_v63, %v468_v60  ;;  %v848_v7 = vmul.f32 %v468_v60, %v468_v60  ;;  %705 = vst [vmem:[%s1695_s2 + $0x138] sm:$0xff] %v1497_v62 }
 0x12a   :  { %v897_v8 = vadd.f32 %v896_v5, %v848_v7 }
 0x12d   :  { %v473_v9 = vpop.f32.mrb[28].mxu0  ;;  %v1513_v10 = vpop.f32.mrb[28].mxu1 }
 0x12e   :  { %v1066_v11 = vpop.f32.mrb[29].mxu0  ;;  %v1118_v13 = vpop.f32.mrb[29].mxu1  ;;  %680 = vst [vmem:[%s1695_s2 + $0x70] sm:$0xff] %v473_v9  ;;  %v790_v17 = vadd.f32 %v789_v6, %v473_v9  ;;  %v849_v18 = vmul.f32 %v473_v9, %v473_v9  ;;  %706 = vst [vmem:[%s1695_s2 + $0x140] sm:$0xff] %v1513_v10 }
 0x12f   :  { %v476_v14 = vpop.f32.mrb[30].mxu0  ;;  %v1515_v15 = vpop.f32.mrb[30].mxu1 }
 0x130   :  { %v1067_v19 = vpop.f32.mrb[31].mxu0  ;;  %v1119_v0 = vpop.f32.mrb[31].mxu1  ;;  %v898_v20 = vadd.f32 %v897_v8, %v849_v18  ;;  %681 = vst [vmem:[%s1695_s2 + $0x78] sm:$0xff] %v476_v14  ;;  %v791_v21 = vadd.f32 %v790_v17, %v476_v14  ;;  %v850_v22 = vmul.f32 %v476_v14, %v476_v14  ;;  %707 = vst [vmem:[%s1695_s2 + $0x148] sm:$0xff] %v1515_v15 }
 0x132   :  { %v899_v23 = vadd.f32 %v898_v20, %v850_v22 }
 0x135   :  { %v481_v24 = vpop.f32.mrb[32].mxu0  ;;  %v1531_v26 = vpop.f32.mrb[32].mxu1 }
 0x136   :  { %v1070_v27 = vpop.f32.mrb[33].mxu0  ;;  %v1122_v28 = vpop.f32.mrb[33].mxu1  ;;  %682 = vst [vmem:[%s1695_s2 + $0x80] sm:$0xff] %v481_v24  ;;  %v792_v32 = vadd.f32 %v791_v21, %v481_v24  ;;  %v851_v33 = vmul.f32 %v481_v24, %v481_v24  ;;  %708 = vst [vmem:[%s1695_s2 + $0x150] sm:$0xff] %v1531_v26 }
 0x137   :  { %v484_v30 = vpop.f32.mrb[34].mxu0  ;;  %v1533_v31 = vpop.f32.mrb[34].mxu1 }
 0x138   :  { %v1071_v34 = vpop.f32.mrb[35].mxu0  ;;  %v1123_v36 = vpop.f32.mrb[35].mxu1  ;;  %v900_v37 = vadd.f32 %v899_v23, %v851_v33  ;;  %683 = vst [vmem:[%s1695_s2 + $0x88] sm:$0xff] %v484_v30  ;;  %v793_v38 = vadd.f32 %v792_v32, %v484_v30  ;;  %v852_v40 = vmul.f32 %v484_v30, %v484_v30  ;;  %709 = vst [vmem:[%s1695_s2 + $0x158] sm:$0xff] %v1533_v31 }
 0x13a   :  { %v901_v42 = vadd.f32 %v900_v37, %v852_v40 }
 0x13d   :  { %v489_v43 = vpop.f32.mrb[36].mxu0  ;;  %v1549_v44 = vpop.f32.mrb[36].mxu1 }
 0x13e   :  { %v1074_v46 = vpop.f32.mrb[37].mxu0  ;;  %v1126_v48 = vpop.f32.mrb[37].mxu1  ;;  %684 = vst [vmem:[%s1695_s2 + $0x90] sm:$0xff] %v489_v43  ;;  %v794_v52 = vadd.f32 %v793_v38, %v489_v43  ;;  %v853_v53 = vmul.f32 %v489_v43, %v489_v43  ;;  %710 = vst [vmem:[%s1695_s2 + $0x160] sm:$0xff] %v1549_v44 }
 0x13f   :  { %v492_v49 = vpop.f32.mrb[38].mxu0  ;;  %v1551_v50 = vpop.f32.mrb[38].mxu1 }
 0x140   :  { %v1075_v54 = vpop.f32.mrb[39].mxu0  ;;  %v1127_v55 = vpop.f32.mrb[39].mxu1  ;;  %v902_v56 = vadd.f32 %v901_v42, %v853_v53  ;;  %685 = vst [vmem:[%s1695_s2 + $0x98] sm:$0xff] %v492_v49  ;;  %v795_v58 = vadd.f32 %v794_v52, %v492_v49  ;;  %v854_v59 = vmul.f32 %v492_v49, %v492_v49  ;;  %711 = vst [vmem:[%s1695_s2 + $0x168] sm:$0xff] %v1551_v50 }
 0x141   :  { %v861_v53 = vmul.f32 %v1379_v35, %v1379_v35 }
 0x142   :  { %v903_v60 = vadd.f32 %v902_v56, %v854_v59  ;;  %v862_v56 = vmul.f32 %v1381_v39, %v1381_v39 }
 0x145   :  { %v497_v63 = vpop.f32.mrb[40].mxu0  ;;  %v1567_v1 = vpop.f32.mrb[40].mxu1 }
 0x146   :  { %v1078_v3 = vpop.f32.mrb[41].mxu0  ;;  %v1130_v4 = vpop.f32.mrb[41].mxu1  ;;  %686 = vst [vmem:[%s1695_s2 + $0xa0] sm:$0xff] %v497_v63  ;;  %v796_v7 = vadd.f32 %v795_v58, %v497_v63  ;;  %v855_v8 = vmul.f32 %v497_v63, %v497_v63  ;;  %712 = vst [vmem:[%s1695_s2 + $0x170] sm:$0xff] %v1567_v1 }
 0x147   :  { %v500_v5 = vpop.f32.mrb[42].mxu0  ;;  %v1569_v6 = vpop.f32.mrb[42].mxu1  ;;  %v864_v4 = vmul.f32 %v1399_v51, %v1399_v51 }
 0x148   :  { %v1079_v9 = vpop.f32.mrb[43].mxu0  ;;  %v1131_v11 = vpop.f32.mrb[43].mxu1  ;;  %v904_v13 = vadd.f32 %v903_v60, %v855_v8  ;;  %687 = vst [vmem:[%s1695_s2 + $0xa8] sm:$0xff] %v500_v5  ;;  %v797_v14 = vadd.f32 %v796_v7, %v500_v5  ;;  %v856_v17 = vmul.f32 %v500_v5, %v500_v5  ;;  %713 = vst [vmem:[%s1695_s2 + $0x178] sm:$0xff] %v1569_v6 }
 0x149   :  { %v863_v60 = vmul.f32 %v1397_v47, %v1397_v47 }
 0x14a   :  { %v905_v18 = vadd.f32 %v904_v13, %v856_v17 }
 0x14d   :  { %v505_v19 = vpop.f32.mrb[44].mxu0  ;;  %v1585_v0 = vpop.f32.mrb[44].mxu1 }
 0x14e   :  { %v1082_v20 = vpop.f32.mrb[45].mxu0  ;;  %v1134_v21 = vpop.f32.mrb[45].mxu1  ;;  %688 = vst [vmem:[%s1695_s2 + $0xb0] sm:$0xff] %v505_v19  ;;  %v798_v24 = vadd.f32 %v797_v14, %v505_v19  ;;  %v857_v27 = vmul.f32 %v505_v19, %v505_v19  ;;  %714 = vst [vmem:[%s1695_s2 + $0x180] sm:$0xff] %v1585_v0 }
 0x14f   :  { %v508_v22 = vpop.f32.mrb[46].mxu0  ;;  %v1587_v23 = vpop.f32.mrb[46].mxu1 }
 0x150   :  { %v1083_v28 = vpop.f32.mrb[47].mxu0  ;;  %v1135_v30 = vpop.f32.mrb[47].mxu1  ;;  %v906_v32 = vadd.f32 %v905_v18, %v857_v27  ;;  %689 = vst [vmem:[%s1695_s2 + $0xb8] sm:$0xff] %v508_v22  ;;  %v799_v33 = vadd.f32 %v798_v24, %v508_v22  ;;  %v858_v34 = vmul.f32 %v508_v22, %v508_v22  ;;  %715 = vst [vmem:[%s1695_s2 + $0x188] sm:$0xff] %v1587_v23 }
 0x152   :  { %v907_v36 = vadd.f32 %v906_v32, %v858_v34 }
 0x155   :  { %v513_v37 = vpop.f32.mrb[48].mxu0 }
 0x156   :  { %v1086_v38 = vpop.f32.mrb[49].mxu0  ;;  %690 = vst [vmem:[%s1695_s2 + $0xc0] sm:$0xff] %v513_v37  ;;  %v800_v42 = vadd.f32 %v799_v33, %v513_v37  ;;  %v859_v43 = vmul.f32 %v513_v37, %v513_v37  ;;  %v873_v33 = vmul.f32 %v1495_v57, %v1495_v57  ;;  %v874_v37 = vmul.f32 %v1497_v62, %v1497_v62 }
 0x157   :  { %v516_v40 = vpop.f32.mrb[50].mxu0 }
 0x158   :  { %v1087_v46 = vpop.f32.mrb[51].mxu0  ;;  %v908_v48 = vadd.f32 %v907_v36, %v859_v43  ;;  %691 = vst [vmem:[%s1695_s2 + $0xc8] sm:$0xff] %v516_v40  ;;  %v801_v49 = vadd.f32 %v800_v42, %v516_v40  ;;  %v860_v52 = vmul.f32 %v516_v40, %v516_v40  ;;  %v875_v40 = vmul.f32 %v1513_v10, %v1513_v10 }
 0x159   :  { %v876_v43 = vmul.f32 %v1515_v15, %v1515_v15 }
 0x15a   :  { %v802_v54 = vadd.f32 %v801_v49, %v1379_v35  ;;  %v909_v55 = vadd.f32 %v908_v48, %v860_v52  ;;  %v865_v35 = vmul.f32 %v1415_v61, %v1415_v61  ;;  %v877_v48 = vmul.f32 %v1531_v26, %v1531_v26 }
 0x15b   :  { %v878_v52 = vmul.f32 %v1533_v31, %v1533_v31 }
 0x15c   :  { %v803_v58 = vadd.f32 %v802_v54, %v1381_v39  ;;  %v910_v59 = vadd.f32 %v909_v55, %v861_v53  ;;  %v866_v39 = vmul.f32 %v1417_v2, %v1417_v2  ;;  %v879_v54 = vmul.f32 %v1549_v44, %v1549_v44 }
 0x15e   :  { %v804_v63 = vadd.f32 %v803_v58, %v1397_v47  ;;  %v911_v3 = vadd.f32 %v910_v59, %v862_v56  ;;  %v867_v47 = vmul.f32 %v1441_v12, %v1441_v12  ;;  %v880_v56 = vmul.f32 %v1551_v50, %v1551_v50 }
 0x15f   :  { %v881_v59 = vmul.f32 %v1567_v1, %v1567_v1 }
 0x160   :  { %v805_v5 = vadd.f32 %v804_v63, %v1399_v51  ;;  %v912_v7 = vadd.f32 %v911_v3, %v863_v60  ;;  %v868_v51 = vmul.f32 %v1443_v16, %v1443_v16  ;;  %v882_v63 = vmul.f32 %v1569_v6, %v1569_v6 }
 0x162   :  { %v806_v8 = vadd.f32 %v805_v5, %v1415_v61  ;;  %v913_v9 = vadd.f32 %v912_v7, %v864_v4  ;;  %v869_v61 = vmul.f32 %v1459_v25, %v1459_v25  ;;  %v884_v7 = vmul.f32 %v1587_v23, %v1587_v23 }
 0x164   :  { %v807_v11 = vadd.f32 %v806_v8, %v1417_v2  ;;  %v914_v13 = vadd.f32 %v913_v9, %v865_v35  ;;  %v870_v2 = vmul.f32 %v1461_v29, %v1461_v29 }
 0x166   :  { %v915_v14 = vadd.f32 %v914_v13, %v866_v39  ;;  %v808_v17 = vadd.f32 %v807_v11, %v1441_v12  ;;  %v871_v12 = vmul.f32 %v1477_v41, %v1477_v41 }
 0x168   :  { %v809_v18 = vadd.f32 %v808_v17, %v1443_v16  ;;  %v916_v19 = vadd.f32 %v915_v14, %v867_v47  ;;  %v872_v16 = vmul.f32 %v1479_v45, %v1479_v45 }
 0x16a   :  { %v810_v20 = vadd.f32 %v809_v18, %v1459_v25  ;;  %v917_v21 = vadd.f32 %v916_v19, %v868_v51 }
 0x16c   :  { %v811_v22 = vadd.f32 %v810_v20, %v1461_v29  ;;  %v918_v24 = vadd.f32 %v917_v21, %v869_v61 }
 0x16e   :  { %v812_v27 = vadd.f32 %v811_v22, %v1477_v41  ;;  %v919_v28 = vadd.f32 %v918_v24, %v870_v2 }
 0x170   :  { %v813_v30 = vadd.f32 %v812_v27, %v1479_v45  ;;  %v920_v32 = vadd.f32 %v919_v28, %v871_v12 }
 0x172   :  { %v814_v25 = vadd.f32 %v813_v30, %v1495_v57  ;;  %v921_v34 = vadd.f32 %v920_v32, %v872_v16 }
 0x174   :  { %v922_v29 = vadd.f32 %v921_v34, %v873_v33  ;;  %v815_v36 = vadd.f32 %v814_v25, %v1497_v62 }
 0x176   :  { %v923_v41 = vadd.f32 %v922_v29, %v874_v37  ;;  %v816_v38 = vadd.f32 %v815_v36, %v1513_v10 }
 0x178   :  { %v924_v45 = vadd.f32 %v923_v41, %v875_v40  ;;  %v817_v42 = vadd.f32 %v816_v38, %v1515_v15 }
 0x17a   :  { %v925_v57 = vadd.f32 %v924_v45, %v876_v43  ;;  %v818_v46 = vadd.f32 %v817_v42, %v1531_v26 }
 0x17c   :  { %v926_v49 = vadd.f32 %v925_v57, %v877_v48  ;;  %v819_v62 = vadd.f32 %v818_v46, %v1533_v31 }
 0x17e   :  { %v927_v53 = vadd.f32 %v926_v49, %v878_v52  ;;  %v820_v10 = vadd.f32 %v819_v62, %v1549_v44  ;;  %v883_v44 = vmul.f32 %v1585_v0, %v1585_v0 }
 0x180   :  { %v928_v55 = vadd.f32 %v927_v53, %v879_v54  ;;  %v821_v15 = vadd.f32 %v820_v10, %v1551_v50 }
 0x182   :  { %v929_v58 = vadd.f32 %v928_v55, %v880_v56  ;;  %v822_v26 = vadd.f32 %v821_v15, %v1567_v1 }
 0x184   :  { %v930_v60 = vadd.f32 %v929_v58, %v881_v59  ;;  %v823_v31 = vadd.f32 %v822_v26, %v1569_v6 }
 0x186   :  { %v931_v3 = vadd.f32 %v930_v60, %v882_v63  ;;  %v824_v4 = vadd.f32 %v823_v31, %v1585_v0  ;;  %v776_v0 = vld [vmem:[%s1696_s3] sm:$0x1] }
 0x188   :  { %v932_v5 = vadd.f32 %v931_v3, %v883_v44  ;;  %v825_v50 = vadd.f32 %v824_v4, %v1587_v23  ;;  %v834_v23 = vld [vmem:[%s1697_s4] sm:$0x1] }
 0x18a   :  { %v826_v35 = vrot.slane %v825_v50, 4  ;;  %v933_v1 = vadd.f32 %v932_v5, %v884_v7 }
 0x18c   :  { %v827_v8 = vadd.f32 %v826_v35, %v825_v50  ;;  %v934_v9 = vrot.slane %v933_v1, 4 }
 0x18e   :  { %v828_v39 = vrot.slane %v827_v8, 2  ;;  %v935_v11 = vadd.f32 %v934_v9, %v933_v1 }
 0x190   :  { %v829_v13 = vadd.f32 %v828_v39, %v827_v8  ;;  %v936_v6 = vrot.slane %v935_v11, 2 }
 0x192   :  { %v830_v47 = vrot.slane %v829_v13, 1  ;;  %v937_v14 = vadd.f32 %v936_v6, %v935_v11 }
 0x194   :  { %v831_v17 = vadd.f32 %v830_v47, %v829_v13  ;;  %v938_v51 = vrot.slane %v937_v14, 1 }
 0x196   :  { %v832_v18 = vadd.f32 %v831_v17, %v776_v0  ;;  %v939_v19 = vadd.f32 %v938_v51, %v937_v14 }
 0x198   :  { %833 = vst [vmem:[%s1696_s3] sm:$0x1] %v832_v18  ;;  %v940_v61 = vadd.f32 %v939_v19, %v834_v23 }
 0x19a   :  { %941 = vst [vmem:[%s1697_s4] sm:$0x1] %v940_v61 }

// kernel: bottleneck_forward.10
= control target key start
LH: loop header
LB: loop body
LE: loop exit
PB: predicated region body
PF: predicated region fallthrough
CT: control target
= control target key end

     0   :  { %s318_s0 = inlined_call_operand.vmem [shape: f32[112,128], index: 0, kind: input, shape index: {}]   ;;  %s319_s1 = inlined_call_operand.vmem [shape: f32[1,128], index: 1, kind: input, shape index: {}]   ;;  %s320_s2 = inlined_call_operand.vmem [shape: f32[1,128], index: 2, kind: input, shape index: {}]   ;;  %s321_s3 = inlined_call_operand.vmem [shape: bf16[112,128], index: 3, kind: output, shape index: {}]  }
   0x1   :  { %v14_v0 = vld [vmem:[%s318_s0] sm:$0xff]  ;;  %v15_v1 = vld [vmem:[%s318_s0 + $0x8] sm:$0xff]  ;;  %v16_v6 = vld [vmem:[%s318_s0 + $0x10] sm:$0xff] }
   0x2   :  { %v158_v2 = vld [vmem:[%s319_s1] ss:$0 sm:$0xff]  ;;  %v17_v7 = vld [vmem:[%s318_s0 + $0x18] sm:$0xff]  ;;  %v19_v11 = vld [vmem:[%s318_s0 + $0x28] sm:$0xff] }
   0x3   :  { %v35_v3 = vmul.f32 %v158_v2, %v14_v0  ;;  %v36_v4 = vmul.f32 %v158_v2, %v15_v1  ;;  %v159_v5 = vld [vmem:[%s320_s2] ss:$0 sm:$0xff]  ;;  %v37_v8 = vmul.f32 %v158_v2, %v16_v6  ;;  %v38_v9 = vmul.f32 %v158_v2, %v17_v7  ;;  %v20_v12 = vld [vmem:[%s318_s0 + $0x30] sm:$0xff]  ;;  %v21_v17 = vld [vmem:[%s318_s0 + $0x38] sm:$0xff] }
   0x4   :  { %v18_v10 = vld [vmem:[%s318_s0 + $0x20] sm:$0xff]  ;;  %v40_v16 = vmul.f32 %v158_v2, %v19_v11  ;;  %v41_v20 = vmul.f32 %v158_v2, %v20_v12  ;;  %v42_v21 = vmul.f32 %v158_v2, %v21_v17  ;;  %v23_v27 = vld [vmem:[%s318_s0 + $0x48] sm:$0xff]  ;;  %v24_v32 = vld [vmem:[%s318_s0 + $0x50] sm:$0xff] }
   0x5   :  { %v56_v13 = vadd.f32 %v159_v5, %v35_v3  ;;  %v57_v14 = vadd.f32 %v159_v5, %v36_v4  ;;  %v39_v15 = vmul.f32 %v158_v2, %v18_v10  ;;  %v58_v18 = vadd.f32 %v159_v5, %v37_v8  ;;  %v22_v22 = vld [vmem:[%s318_s0 + $0x40] sm:$0xff]  ;;  %v25_v33 = vld [vmem:[%s318_s0 + $0x58] sm:$0xff]  ;;  %v27_v39 = vld [vmem:[%s318_s0 + $0x68] sm:$0xff] }
   0x6   :  { %v59_v19 = vadd.f32 %v159_v5, %v38_v9  ;;  %v61_v26 = vadd.f32 %v159_v5, %v40_v16  ;;  %v62_v30 = vadd.f32 %v159_v5, %v41_v20  ;;  %v63_v31 = vadd.f32 %v159_v5, %v42_v21  ;;  %v26_v38 = vld [vmem:[%s318_s0 + $0x60] sm:$0xff] }
   0x7   :  { %v70_v23 = vmax.f32 %v56_v13, 0.0  ;;  %v71_v24 = vmax.f32 %v57_v14, 0.0  ;;  %v60_v25 = vadd.f32 %v159_v5, %v39_v15  ;;  %v72_v28 = vmax.f32 %v58_v18, 0.0 }
   0x8   :  { %v73_v29 = vmax.f32 %v59_v19, 0.0  ;;  %v75_v36 = vmax.f32 %v61_v26, 0.0  ;;  %v43_v37 = vmul.f32 %v158_v2, %v22_v22  ;;  %v76_v41 = vmax.f32 %v62_v30, 0.0 }
   0x9   :  { %v191_v34 = vpack.c.bf16 %v71_v24, %v70_v23  ;;  %v74_v35 = vmax.f32 %v60_v25, 0.0  ;;  %v77_v42 = vmax.f32 %v63_v31, 0.0  ;;  %v44_v43 = vmul.f32 %v158_v2, %v23_v27 }
   0xa   :  { %v196_v40 = vpack.c.bf16 %v73_v29, %v72_v28  ;;  %v64_v45 = vadd.f32 %v159_v5, %v43_v37  ;;  %v45_v46 = vmul.f32 %v158_v2, %v24_v32  ;;  %v46_v47 = vmul.f32 %v158_v2, %v25_v33 }
   0xb   :  { %192 = vst [vmem:[%s321_s3] sm:$0xff] %v191_v34   ;;  %v201_v44 = vpack.c.bf16 %v75_v36, %v74_v35  ;;  %v206_v48 = vpack.c.bf16 %v77_v42, %v76_v41  ;;  %v65_v49 = vadd.f32 %v159_v5, %v44_v43  ;;  %v47_v50 = vmul.f32 %v158_v2, %v26_v38 }
   0xc   :  { %223 = vst [vmem:[%s321_s3 + $0x8] sm:$0xff] %v196_v40   ;;  %v48_v51 = vmul.f32 %v158_v2, %v27_v39  ;;  %v78_v52 = vmax.f32 %v64_v45, 0.0  ;;  %v66_v53 = vadd.f32 %v159_v5, %v45_v46  ;;  %v67_v54 = vadd.f32 %v159_v5, %v46_v47 }
   0xd   :  { %224 = vst [vmem:[%s321_s3 + $0x10] sm:$0xff] %v201_v44   ;;  %225 = vst [vmem:[%s321_s3 + $0x18] sm:$0xff] %v206_v48   ;;  %v79_v55 = vmax.f32 %v65_v49, 0.0  ;;  %v68_v56 = vadd.f32 %v159_v5, %v47_v50 }
   0xe   :  { %v69_v57 = vadd.f32 %v159_v5, %v48_v51  ;;  %v80_v58 = vmax.f32 %v66_v53, 0.0  ;;  %v81_v59 = vmax.f32 %v67_v54, 0.0 }
   0xf   :  { %v211_v60 = vpack.c.bf16 %v79_v55, %v78_v52  ;;  %v82_v61 = vmax.f32 %v68_v56, 0.0 }
  0x10   :  { %v83_v62 = vmax.f32 %v69_v57, 0.0  ;;  %v216_v63 = vpack.c.bf16 %v81_v59, %v80_v58 }
  0x11   :  { %226 = vst [vmem:[%s321_s3 + $0x20] sm:$0xff] %v211_v60  }
  0x12   :  { %v221_v0 = vpack.c.bf16 %v83_v62, %v82_v61  ;;  %227 = vst [vmem:[%s321_s3 + $0x28] sm:$0xff] %v216_v63  }
  0x14   :  { %228 = vst [vmem:[%s321_s3 + $0x30] sm:$0xff] %v221_v0  }

// kernel: bottleneck_forward.9
= control target key start
LH: loop header
LB: loop body
LE: loop exit
PB: predicated region body
PF: predicated region fallthrough
CT: control target
= control target key end

     0   :  { %v485_v0 = vmov 0.0   ;;  %vm486_vm0 = vmmov 0   ;;  %s661_s1 = inlined_call_operand.vmem [shape: bf16[128,128], index: 1, kind: input, shape index: {}]   ;;  %s662_s0 = inlined_call_operand.vmem [shape: bf16[112,128], index: 0, kind: input, shape index: {}]   ;;  %s663_s3 = inlined_call_operand.vmem [shape: f32[1,128], index: 3, kind: output, shape index: {1}]   ;;  %s664_s4 = inlined_call_operand.vmem [shape: f32[1,128], index: 4, kind: output, shape index: {2}]   ;;  %s665_s2 = inlined_call_operand.vmem [shape: f32[112,128], index: 2, kind: output, shape index: {0}]  }
   0x1   :  { %408 = vmatprep.subr.bf16.mxu0 %v485_v0  ;;  %v470_v1 = vld [vmem:[%s661_s1] sm:$0xff]   ;;  %452 = vmatprep.subr.bf16.mxu1 %v485_v0  ;;  %v471_v2 = vld [vmem:[%s661_s1 + $0x8] sm:$0xff]   ;;  %v472_v3 = vld [vmem:[%s661_s1 + $0x10] sm:$0xff]   ;;  %289 = vst [vmem:[%s663_s3] sm:$0x1] %v485_v0 }
   0x2   :  { %424 = vmatprep.mubr.msk.bf16.mxu0 %vm486_vm0, %v485_v0  ;;  %440 = vmatprep.mubr.msk.bf16.mxu1 %vm486_vm0, %v485_v0  ;;  %v473_v4 = vld [vmem:[%s661_s1 + $0x18] sm:$0xff]   ;;  %v474_v5 = vld [vmem:[%s661_s1 + $0x20] sm:$0xff]   ;;  %v475_v6 = vld [vmem:[%s661_s1 + $0x28] sm:$0xff]   ;;  %290 = vst [vmem:[%s664_s4] sm:$0x1] %v485_v0 }
   0x3   :  { %409 = vmatpush3.bf16.msra.mxu0 %v470_v1  ;;  %460 = vmatpush3.bf16.msra.mxu1 %v470_v1  ;;  %v476_v7 = vld [vmem:[%s661_s1 + $0x30] sm:$0xff]   ;;  %v477_v8 = vld [vmem:[%s661_s1 + $0x38] sm:$0xff]   ;;  %v478_v9 = vld [vmem:[%s662_s0] sm:$0xff]  }
   0x4   :  { %410 = vmatprep.subr.bf16.mxu0 %v485_v0  ;;  %453 = vmatprep.subr.bf16.mxu1 %v485_v0  ;;  %v481_v10 = vld [vmem:[%s662_s0 + $0x20] sm:$0xff]   ;;  %v479_v11 = vld [vmem:[%s662_s0 + $0x8] sm:$0xff]   ;;  %v480_v13 = vld [vmem:[%s662_s0 + $0x10] sm:$0xff]  }
   0x5   :  { %v483_v12 = vld [vmem:[%s662_s0 + $0x28] sm:$0xff]   ;;  %v484_v14 = vld [vmem:[%s662_s0 + $0x30] sm:$0xff]   ;;  %v482_v15 = vld [vmem:[%s662_s0 + $0x18] sm:$0xff]  }
   0x7   :  { %411 = vmatpush3.bf16.msra.mxu0 %v471_v2  ;;  %461 = vmatpush3.bf16.msra.mxu1 %v471_v2 }
   0x8   :  { %412 = vmatprep.subr.bf16.mxu0 %v485_v0  ;;  %454 = vmatprep.subr.bf16.mxu1 %v485_v0 }
   0xb   :  { %413 = vmatpush3.bf16.msra.mxu0 %v472_v3  ;;  %462 = vmatpush3.bf16.msra.mxu1 %v472_v3 }
   0xc   :  { %414 = vmatprep.subr.bf16.mxu0 %v485_v0  ;;  %455 = vmatprep.subr.bf16.mxu1 %v485_v0 }
   0xf   :  { %415 = vmatpush3.bf16.msra.mxu0 %v473_v4  ;;  %463 = vmatpush3.bf16.msra.mxu1 %v473_v4 }
  0x10   :  { %416 = vmatprep.subr.bf16.mxu0 %v485_v0  ;;  %456 = vmatprep.subr.bf16.mxu1 %v485_v0 }
  0x13   :  { %417 = vmatpush3.bf16.msra.mxu0 %v474_v5  ;;  %464 = vmatpush3.bf16.msra.mxu1 %v474_v5 }
  0x14   :  { %418 = vmatprep.subr.bf16.mxu0 %v485_v0  ;;  %457 = vmatprep.subr.bf16.mxu1 %v485_v0 }
  0x17   :  { %419 = vmatpush3.bf16.msra.mxu0 %v475_v6  ;;  %465 = vmatpush3.bf16.msra.mxu1 %v475_v6 }
  0x18   :  { %420 = vmatprep.subr.bf16.mxu0 %v485_v0  ;;  %458 = vmatprep.subr.bf16.mxu1 %v485_v0 }
  0x1b   :  { %421 = vmatpush3.bf16.msra.mxu0 %v476_v7  ;;  %466 = vmatpush3.bf16.msra.mxu1 %v476_v7 }
  0x1c   :  { %422 = vmatprep.subr.bf16.mxu0 %v485_v0  ;;  %459 = vmatprep.subr.bf16.mxu1 %v485_v0 }
  0x1f   :  { %423 = vmatpush3.bf16.msra.mxu0 %v477_v8  ;;  %467 = vmatpush3.bf16.msra.mxu1 %v477_v8 }
  0x22   :  { %425 = vmatmul.mubr.bf16.vlgmr.msra.gmra.mrb[0].mxu0 %v478_v9  ;;  %441 = vmatmul.mubr.bf16.vlgmr.msra.gmra.mrb[0].mxu1 %v481_v10 }
  0x23   :  { %428 = vmatprep.mubr.msk.bf16.mxu0 %vm486_vm0, %v485_v0  ;;  %444 = vmatprep.mubr.msk.bf16.mxu1 %vm486_vm0, %v485_v0 }
  0x2a   :  { %429 = vmatmul.mubr.bf16.gmra.mrb[4].mxu0 %v479_v11  ;;  %445 = vmatmul.mubr.bf16.gmra.mrb[4].mxu1 %v483_v12 }
  0x2b   :  { %432 = vmatprep.mubr.msk.bf16.mxu0 %vm486_vm0, %v485_v0  ;;  %448 = vmatprep.mubr.msk.bf16.mxu1 %vm486_vm0, %v485_v0 }
  0x32   :  { %433 = vmatmul.mubr.bf16.gmra.mrb[8].mxu0 %v480_v13  ;;  %449 = vmatmul.mubr.bf16.gmra.mrb[8].mxu1 %v484_v14 }
  0x33   :  { %436 = vmatprep.mubr.msk.bf16.mxu0 %vm486_vm0, %v485_v0 }
  0x3a   :  { %437 = vmatmul.mubr.bf16.gmra.mrb[12].mxu0 %v482_v15 }
  0xf5   :  { %v201_v16 = vpop.f32.mrb[0].mxu0  ;;  %v595_v17 = vpop.f32.mrb[0].mxu1 }
  0xf6   :  { %v426_v18 = vpop.f32.mrb[1].mxu0  ;;  %v442_v19 = vpop.f32.mrb[1].mxu1  ;;  %270 = vst [vmem:[%s665_s2] sm:$0xff] %v201_v16  ;;  %278 = vst [vmem:[%s665_s2 + $0x40] sm:$0xff] %v595_v17  ;;  %v331_v24 = vmul.f32 %v201_v16, %v201_v16  ;;  %v339_v1 = vmul.f32 %v595_v17, %v595_v17 }
  0xf7   :  { %v204_v20 = vpop.f32.mrb[2].mxu0  ;;  %v597_v21 = vpop.f32.mrb[2].mxu1 }
  0xf8   :  { %v427_v22 = vpop.f32.mrb[3].mxu0  ;;  %v443_v23 = vpop.f32.mrb[3].mxu1  ;;  %271 = vst [vmem:[%s665_s2 + $0x8] sm:$0xff] %v204_v20  ;;  %v309_v25 = vadd.f32 %v204_v20, %v201_v16  ;;  %v332_v26 = vmul.f32 %v204_v20, %v204_v20  ;;  %279 = vst [vmem:[%s665_s2 + $0x48] sm:$0xff] %v597_v21  ;;  %v340_v4 = vmul.f32 %v597_v21, %v597_v21 }
  0xfa   :  { %v345_v27 = vadd.f32 %v332_v26, %v331_v24 }
  0xfd   :  { %v209_v28 = vpop.f32.mrb[4].mxu0  ;;  %v241_v29 = vpop.f32.mrb[4].mxu1 }
  0xfe   :  { %v430_v30 = vpop.f32.mrb[5].mxu0  ;;  %v446_v31 = vpop.f32.mrb[5].mxu1  ;;  %272 = vst [vmem:[%s665_s2 + $0x10] sm:$0xff] %v209_v28  ;;  %v310_v34 = vadd.f32 %v309_v25, %v209_v28  ;;  %v333_v35 = vmul.f32 %v209_v28, %v209_v28  ;;  %280 = vst [vmem:[%s665_s2 + $0x50] sm:$0xff] %v241_v29  ;;  %v341_v7 = vmul.f32 %v241_v29, %v241_v29 }
  0xff   :  { %v212_v32 = vpop.f32.mrb[6].mxu0  ;;  %v244_v33 = vpop.f32.mrb[6].mxu1 }
 0x100   :  { %v431_v36 = vpop.f32.mrb[7].mxu0  ;;  %v447_v37 = vpop.f32.mrb[7].mxu1  ;;  %v346_v38 = vadd.f32 %v345_v27, %v333_v35  ;;  %273 = vst [vmem:[%s665_s2 + $0x18] sm:$0xff] %v212_v32  ;;  %v311_v39 = vadd.f32 %v310_v34, %v212_v32  ;;  %v334_v40 = vmul.f32 %v212_v32, %v212_v32  ;;  %281 = vst [vmem:[%s665_s2 + $0x58] sm:$0xff] %v244_v33  ;;  %v330_v32 = vld [vmem:[%s664_s4] sm:$0x1] }
 0x101   :  { %v342_v11 = vmul.f32 %v244_v33, %v244_v33 }
 0x102   :  { %v347_v41 = vadd.f32 %v346_v38, %v334_v40 }
 0x105   :  { %v217_v42 = vpop.f32.mrb[8].mxu0  ;;  %v249_v43 = vpop.f32.mrb[8].mxu1 }
 0x106   :  { %v434_v44 = vpop.f32.mrb[9].mxu0  ;;  %v450_v45 = vpop.f32.mrb[9].mxu1  ;;  %274 = vst [vmem:[%s665_s2 + $0x20] sm:$0xff] %v217_v42  ;;  %v312_v48 = vadd.f32 %v311_v39, %v217_v42  ;;  %v335_v49 = vmul.f32 %v217_v42, %v217_v42  ;;  %282 = vst [vmem:[%s665_s2 + $0x60] sm:$0xff] %v249_v43  ;;  %v343_v13 = vmul.f32 %v249_v43, %v249_v43 }
 0x107   :  { %v220_v46 = vpop.f32.mrb[10].mxu0  ;;  %v252_v47 = vpop.f32.mrb[10].mxu1 }
 0x108   :  { %v435_v50 = vpop.f32.mrb[11].mxu0  ;;  %v451_v51 = vpop.f32.mrb[11].mxu1  ;;  %v348_v52 = vadd.f32 %v347_v41, %v335_v49  ;;  %275 = vst [vmem:[%s665_s2 + $0x28] sm:$0xff] %v220_v46  ;;  %v313_v53 = vadd.f32 %v312_v48, %v220_v46  ;;  %v336_v54 = vmul.f32 %v220_v46, %v220_v46  ;;  %283 = vst [vmem:[%s665_s2 + $0x68] sm:$0xff] %v252_v47 }
 0x109   :  { %v344_v19 = vmul.f32 %v252_v47, %v252_v47 }
 0x10a   :  { %v349_v55 = vadd.f32 %v348_v52, %v336_v54 }
 0x10d   :  { %v225_v56 = vpop.f32.mrb[12].mxu0 }
 0x10e   :  { %v438_v57 = vpop.f32.mrb[13].mxu0  ;;  %276 = vst [vmem:[%s665_s2 + $0x30] sm:$0xff] %v225_v56  ;;  %v314_v59 = vadd.f32 %v313_v53, %v225_v56  ;;  %v337_v60 = vmul.f32 %v225_v56, %v225_v56 }
 0x10f   :  { %v228_v58 = vpop.f32.mrb[14].mxu0 }
 0x110   :  { %v439_v61 = vpop.f32.mrb[15].mxu0  ;;  %v350_v62 = vadd.f32 %v349_v55, %v337_v60  ;;  %277 = vst [vmem:[%s665_s2 + $0x38] sm:$0xff] %v228_v58  ;;  %v315_v63 = vadd.f32 %v314_v59, %v228_v58  ;;  %v338_v0 = vmul.f32 %v228_v58, %v228_v58 }
 0x112   :  { %v316_v2 = vadd.f32 %v315_v63, %v595_v17  ;;  %v351_v3 = vadd.f32 %v350_v62, %v338_v0 }
 0x114   :  { %v352_v5 = vadd.f32 %v351_v3, %v339_v1  ;;  %v317_v6 = vadd.f32 %v316_v2, %v597_v21 }
 0x116   :  { %v318_v8 = vadd.f32 %v317_v6, %v241_v29  ;;  %v353_v9 = vadd.f32 %v352_v5, %v340_v4  ;;  %v308_v29 = vld [vmem:[%s663_s3] sm:$0x1] }
 0x118   :  { %v319_v10 = vadd.f32 %v318_v8, %v244_v33  ;;  %v354_v12 = vadd.f32 %v353_v9, %v341_v7 }
 0x11a   :  { %v355_v14 = vadd.f32 %v354_v12, %v342_v11  ;;  %v320_v15 = vadd.f32 %v319_v10, %v249_v43 }
 0x11c   :  { %v356_v16 = vadd.f32 %v355_v14, %v343_v13  ;;  %v321_v18 = vadd.f32 %v320_v15, %v252_v47 }
 0x11e   :  { %v322_v17 = vrot.slane %v321_v18, 4  ;;  %v357_v20 = vadd.f32 %v356_v16, %v344_v19 }
 0x120   :  { %v323_v22 = vadd.f32 %v322_v17, %v321_v18  ;;  %v358_v23 = vrot.slane %v357_v20, 4 }
 0x122   :  { %v324_v24 = vrot.slane %v323_v22, 2  ;;  %v359_v25 = vadd.f32 %v358_v23, %v357_v20 }
 0x124   :  { %v325_v26 = vadd.f32 %v324_v24, %v323_v22  ;;  %v360_v21 = vrot.slane %v359_v25, 2 }
 0x126   :  { %v326_v27 = vrot.slane %v325_v26, 1  ;;  %v361_v28 = vadd.f32 %v360_v21, %v359_v25 }
 0x128   :  { %v327_v30 = vadd.f32 %v326_v27, %v325_v26  ;;  %v362_v31 = vrot.slane %v361_v28, 1 }
 0x12a   :  { %v328_v33 = vadd.f32 %v327_v30, %v308_v29  ;;  %v363_v34 = vadd.f32 %v362_v31, %v361_v28 }
 0x12c   :  { %329 = vst [vmem:[%s663_s3] sm:$0x1] %v328_v33  ;;  %v364_v35 = vadd.f32 %v363_v34, %v330_v32 }
 0x12e   :  { %365 = vst [vmem:[%s664_s4] sm:$0x1] %v364_v35 }

// kernel: bottleneck_forward.13
= control target key start
LH: loop header
LB: loop body
LE: loop exit
PB: predicated region body
PF: predicated region fallthrough
CT: control target
= control target key end

     0   :  { %s422_s0 = inlined_call_operand.vmem [shape: f32[112,128], index: 0, kind: input, shape index: {}]   ;;  %s423_s1 = inlined_call_operand.vmem [shape: f32[1,128], index: 1, kind: input, shape index: {}]   ;;  %s424_s2 = inlined_call_operand.vmem [shape: f32[1,128], index: 2, kind: input, shape index: {}]   ;;  %s425_s3 = inlined_call_operand.vmem [shape: f32[112,128], index: 3, kind: input, shape index: {}]   ;;  %s426_s4 = inlined_call_operand.vmem [shape: f32[1,128], index: 4, kind: input, shape index: {}]   ;;  %s427_s5 = inlined_call_operand.vmem [shape: f32[1,128], index: 5, kind: input, shape index: {}]   ;;  %s428_s6 = inlined_call_operand.vmem [shape: f32[112,128], index: 6, kind: output, shape index: {}]  }
   0x1   :  { %v23_v0 = vld [vmem:[%s422_s0] sm:$0xff]  ;;  %v24_v8 = vld [vmem:[%s422_s0 + $0x8] sm:$0xff]  ;;  %v25_v10 = vld [vmem:[%s422_s0 + $0x10] sm:$0xff] }
   0x2   :  { %v226_v1 = vld [vmem:[%s423_s1] ss:$0 sm:$0xff]  ;;  %v80_v9 = vld [vmem:[%s425_s3 + $0x8] sm:$0xff]  ;;  %v81_v15 = vld [vmem:[%s425_s3 + $0x10] sm:$0xff] }
   0x3   :  { %v231_v2 = vld [vmem:[%s424_s2] ss:$0 sm:$0xff]  ;;  %v44_v3 = vmul.f32 %v226_v1, %v23_v0  ;;  %v45_v12 = vmul.f32 %v226_v1, %v24_v8  ;;  %v46_v14 = vmul.f32 %v226_v1, %v25_v10  ;;  %v26_v16 = vld [vmem:[%s422_s0 + $0x18] sm:$0xff]  ;;  %v28_v23 = vld [vmem:[%s422_s0 + $0x28] sm:$0xff] }
   0x4   :  { %v79_v4 = vld [vmem:[%s425_s3] sm:$0xff]  ;;  %v82_v17 = vld [vmem:[%s425_s3 + $0x18] sm:$0xff]  ;;  %v47_v19 = vmul.f32 %v226_v1, %v26_v16  ;;  %v84_v28 = vld [vmem:[%s425_s3 + $0x28] sm:$0xff]  ;;  %v49_v33 = vmul.f32 %v226_v1, %v28_v23 }
   0x5   :  { %v240_v5 = vld [vmem:[%s426_s4] ss:$0 sm:$0xff]  ;;  %v65_v11 = vadd.f32 %v231_v2, %v44_v3  ;;  %v66_v25 = vadd.f32 %v231_v2, %v45_v12  ;;  %v67_v26 = vadd.f32 %v231_v2, %v46_v14  ;;  %v29_v29 = vld [vmem:[%s422_s0 + $0x30] sm:$0xff]  ;;  %v30_v39 = vld [vmem:[%s422_s0 + $0x38] sm:$0xff] }
   0x6   :  { %v100_v6 = vmul.f32 %v240_v5, %v79_v4  ;;  %v246_v7 = vld [vmem:[%s427_s5] ss:$0 sm:$0xff]  ;;  %v101_v13 = vmul.f32 %v240_v5, %v80_v9  ;;  %v102_v18 = vmul.f32 %v240_v5, %v81_v15  ;;  %v103_v20 = vmul.f32 %v240_v5, %v82_v17  ;;  %v85_v30 = vld [vmem:[%s425_s3 + $0x30] sm:$0xff]  ;;  %v86_v44 = vld [vmem:[%s425_s3 + $0x38] sm:$0xff] }
   0x7   :  { %v27_v21 = vld [vmem:[%s422_s0 + $0x20] sm:$0xff]  ;;  %v68_v31 = vadd.f32 %v231_v2, %v47_v19  ;;  %v105_v34 = vmul.f32 %v240_v5, %v84_v28  ;;  %v70_v41 = vadd.f32 %v231_v2, %v49_v33  ;;  %v50_v42 = vmul.f32 %v226_v1, %v29_v29  ;;  %v32_v55 = vld [vmem:[%s422_s0 + $0x48] sm:$0xff]  ;;  %v33_v3 = vld [vmem:[%s422_s0 + $0x50] sm:$0xff] }
   0x8   :  { %v83_v22 = vld [vmem:[%s425_s3 + $0x20] sm:$0xff]  ;;  %v114_v24 = vadd.f32 %v100_v6, %v65_v11  ;;  %v48_v27 = vmul.f32 %v226_v1, %v27_v21  ;;  %v115_v36 = vadd.f32 %v101_v13, %v66_v25  ;;  %v116_v37 = vadd.f32 %v102_v18, %v67_v26  ;;  %v88_v60 = vld [vmem:[%s425_s3 + $0x48] sm:$0xff]  ;;  %v89_v4 = vld [vmem:[%s425_s3 + $0x50] sm:$0xff] }
   0x9   :  { %v104_v32 = vmul.f32 %v240_v5, %v83_v22  ;;  %v117_v40 = vadd.f32 %v103_v20, %v68_v31  ;;  %v106_v43 = vmul.f32 %v240_v5, %v85_v30  ;;  %v119_v50 = vadd.f32 %v105_v34, %v70_v41  ;;  %v31_v53 = vld [vmem:[%s422_s0 + $0x40] sm:$0xff]  ;;  %v34_v11 = vld [vmem:[%s422_s0 + $0x58] sm:$0xff]  ;;  %v36_v23 = vld [vmem:[%s422_s0 + $0x68] sm:$0xff] }
   0xa   :  { %v135_v35 = vadd.f32 %v246_v7, %v114_v24  ;;  %v69_v38 = vadd.f32 %v231_v2, %v48_v27  ;;  %v136_v46 = vadd.f32 %v246_v7, %v115_v36  ;;  %v137_v47 = vadd.f32 %v246_v7, %v116_v37  ;;  %v87_v54 = vld [vmem:[%s425_s3 + $0x40] sm:$0xff]  ;;  %v90_v12 = vld [vmem:[%s425_s3 + $0x58] sm:$0xff] }
   0xb   :  { %v138_v49 = vadd.f32 %v246_v7, %v117_v40  ;;  %v71_v51 = vadd.f32 %v231_v2, %v50_v42  ;;  %v51_v52 = vmul.f32 %v226_v1, %v30_v39  ;;  %v107_v59 = vmul.f32 %v240_v5, %v86_v44  ;;  %v35_v17 = vld [vmem:[%s422_s0 + $0x60] sm:$0xff] }
   0xc   :  { %v149_v45 = vmax.f32 %v135_v35, 0.0  ;;  %v118_v48 = vadd.f32 %v104_v32, %v69_v38  ;;  %v150_v56 = vmax.f32 %v136_v46, 0.0  ;;  %v151_v57 = vmax.f32 %v137_v47, 0.0  ;;  %v91_v22 = vld [vmem:[%s425_s3 + $0x60] sm:$0xff]  ;;  %v92_v32 = vld [vmem:[%s425_s3 + $0x68] sm:$0xff] }
   0xd   :  { %v152_v61 = vmax.f32 %v138_v49, 0.0  ;;  %v140_v62 = vadd.f32 %v246_v7, %v119_v50  ;;  %v120_v63 = vadd.f32 %v106_v43, %v71_v51  ;;  %v72_v0 = vadd.f32 %v231_v2, %v51_v52 }
   0xe   :  { %163 = vst [vmem:[%s428_s6] sm:$0xff] %v149_v45  ;;  %v139_v58 = vadd.f32 %v246_v7, %v118_v48  ;;  %164 = vst [vmem:[%s428_s6 + $0x8] sm:$0xff] %v150_v56  ;;  %v52_v8 = vmul.f32 %v226_v1, %v31_v53  ;;  %v108_v9 = vmul.f32 %v240_v5, %v87_v54 }
   0xf   :  { %165 = vst [vmem:[%s428_s6 + $0x10] sm:$0xff] %v151_v57  ;;  %v53_v10 = vmul.f32 %v226_v1, %v32_v55  ;;  %166 = vst [vmem:[%s428_s6 + $0x18] sm:$0xff] %v152_v61  ;;  %v154_v13 = vmax.f32 %v140_v62, 0.0  ;;  %v141_v14 = vadd.f32 %v246_v7, %v120_v63  ;;  %v121_v15 = vadd.f32 %v107_v59, %v72_v0 }
  0x10   :  { %v153_v6 = vmax.f32 %v139_v58, 0.0  ;;  %v109_v16 = vmul.f32 %v240_v5, %v88_v60  ;;  %v73_v18 = vadd.f32 %v231_v2, %v52_v8  ;;  %v54_v20 = vmul.f32 %v226_v1, %v33_v3 }
  0x11   :  { %v74_v19 = vadd.f32 %v231_v2, %v53_v10  ;;  %v110_v21 = vmul.f32 %v240_v5, %v89_v4  ;;  %168 = vst [vmem:[%s428_s6 + $0x28] sm:$0xff] %v154_v13  ;;  %v155_v24 = vmax.f32 %v141_v14, 0.0  ;;  %v142_v25 = vadd.f32 %v246_v7, %v121_v15 }
  0x12   :  { %167 = vst [vmem:[%s428_s6 + $0x20] sm:$0xff] %v153_v6  ;;  %v55_v26 = vmul.f32 %v226_v1, %v34_v11  ;;  %v111_v27 = vmul.f32 %v240_v5, %v90_v12  ;;  %v122_v28 = vadd.f32 %v108_v9, %v73_v18  ;;  %v75_v30 = vadd.f32 %v231_v2, %v54_v20 }
  0x13   :  { %v123_v29 = vadd.f32 %v109_v16, %v74_v19  ;;  %v56_v31 = vmul.f32 %v226_v1, %v35_v17  ;;  %169 = vst [vmem:[%s428_s6 + $0x30] sm:$0xff] %v155_v24  ;;  %v156_v33 = vmax.f32 %v142_v25, 0.0  ;;  %v112_v35 = vmul.f32 %v240_v5, %v91_v22 }
  0x14   :  { %v76_v34 = vadd.f32 %v231_v2, %v55_v26  ;;  %v57_v36 = vmul.f32 %v226_v1, %v36_v23  ;;  %v143_v37 = vadd.f32 %v246_v7, %v122_v28  ;;  %v124_v39 = vadd.f32 %v110_v21, %v75_v30 }
  0x15   :  { %v144_v38 = vadd.f32 %v246_v7, %v123_v29  ;;  %v77_v40 = vadd.f32 %v231_v2, %v56_v31  ;;  %170 = vst [vmem:[%s428_s6 + $0x38] sm:$0xff] %v156_v33  ;;  %v113_v43 = vmul.f32 %v240_v5, %v92_v32 }
  0x16   :  { %v125_v41 = vadd.f32 %v111_v27, %v76_v34  ;;  %v78_v42 = vadd.f32 %v231_v2, %v57_v36  ;;  %v157_v44 = vmax.f32 %v143_v37, 0.0  ;;  %v145_v1 = vadd.f32 %v246_v7, %v124_v39 }
  0x17   :  { %v158_v45 = vmax.f32 %v144_v38, 0.0  ;;  %v126_v46 = vadd.f32 %v112_v35, %v77_v40 }
  0x18   :  { %v146_v47 = vadd.f32 %v246_v7, %v125_v41  ;;  %v127_v48 = vadd.f32 %v113_v43, %v78_v42  ;;  %171 = vst [vmem:[%s428_s6 + $0x40] sm:$0xff] %v157_v44  ;;  %v159_v49 = vmax.f32 %v145_v1, 0.0 }
  0x19   :  { %172 = vst [vmem:[%s428_s6 + $0x48] sm:$0xff] %v158_v45  ;;  %v147_v2 = vadd.f32 %v246_v7, %v126_v46 }
  0x1a   :  { %v160_v5 = vmax.f32 %v146_v47, 0.0  ;;  %v148_v50 = vadd.f32 %v246_v7, %v127_v48  ;;  %173 = vst [vmem:[%s428_s6 + $0x50] sm:$0xff] %v159_v49 }
  0x1b   :  { %v161_v51 = vmax.f32 %v147_v2, 0.0 }
  0x1c   :  { %174 = vst [vmem:[%s428_s6 + $0x58] sm:$0xff] %v160_v5  ;;  %v162_v52 = vmax.f32 %v148_v50, 0.0 }
  0x1d   :  { %175 = vst [vmem:[%s428_s6 + $0x60] sm:$0xff] %v161_v51 }
  0x1e   :  { %176 = vst [vmem:[%s428_s6 + $0x68] sm:$0xff] %v162_v52 }

</bundles_post_ra>
